<compile_context>
chip_gen: v6e
topology: v6e:2x2x1
jax: 0.10.0
libtpu: 0.0.40
codegen_flags: <defaults>
</compile_context>

<pallas_src>
import functools

import jax
import jax.numpy as jnp
import numpy as np
from jax.experimental import pallas as pl
from jax.experimental.pallas import tpu as pltpu


def _round_up(x, m):
    return ((x + m - 1) // m) * m


# ------------------------------------------------------------------ kernels

def _decoder_layer_kernel(x0_ref, ek_ref, ev_ref,
                          w_attn_ref, b_attn_ref,
                          w_ffn1_ref, b_ffn1_ref, w_ffn2_ref, b_ffn2_ref,
                          ln_ref, out_ref, *, num_heads, compute_dtype):
    """grid = (batch, layer): one invocation == one decoder layer for one
    batch row.  The activation is carried in the resident output block."""
    layer = pl.program_id(1)

    len_q, d_model = x0_ref.shape[1], x0_ref.shape[2]
    d_head = d_model // num_heads
    scale = d_head ** (-0.5)

    @pl.when(layer == 0)
    def _():
        out_ref[...] = x0_ref[...]

    def dense(x, w, b):
        # (M, K) @ (K, N) + (1, N); bf16 MXU operands, f32 accumulation.
        return jax.lax.dot_general(
            x.astype(compute_dtype), w.astype(compute_dtype),
            (((1,), (0,)), ((), ())),
            preferred_element_type=jnp.float32) + b

    def layer_norm(y, gamma, beta):
        mu = jnp.mean(y, axis=-1, keepdims=True)
        var = jnp.mean(jnp.square(y - mu), axis=-1, keepdims=True)
        return (y - mu) * jax.lax.rsqrt(var + 1e-5) * gamma + beta

    def mha(q, k, v, n_q, wo, bo):
        # q: (n_q, D) already scaled by 1/sqrt(d_head); k, v: (n_kv, D).
        # True per-head matmuls on d_head-wide slices — head h corresponds to
        # columns [h*d_head, (h+1)*d_head), matching the reference head split.
        kc = k.astype(compute_dtype)
        vc = v.astype(compute_dtype)
        scores = []
        for h in range(num_heads):
            qh = q[:, h * d_head:(h + 1) * d_head].astype(compute_dtype)
            kh = kc[:, h * d_head:(h + 1) * d_head]
            # contract K's last dim directly — no transpose.
            scores.append(jax.lax.dot_general(
                qh, kh, (((1,), (1,)), ((), ())),
                preferred_element_type=jnp.float32))           # (n_q, n_kv)
        # One softmax for all heads (fewer XLU reductions / EUP pushes).
        s_all = jnp.concatenate(scores, axis=0)                # (H*n_q, n_kv)
        s_all = s_all - jnp.max(s_all, axis=-1, keepdims=True)
        p_all = jnp.exp(s_all)
        p_all = p_all * pl.reciprocal(
            jnp.sum(p_all, axis=-1, keepdims=True), approx=True)
        p_all = p_all.astype(compute_dtype)
        outs = []
        for h in range(num_heads):
            ph = p_all[h * n_q:(h + 1) * n_q, :]
            vh = vc[:, h * d_head:(h + 1) * d_head]
            outs.append(jax.lax.dot_general(
                ph, vh, (((1,), (0,)), ((), ())),
                preferred_element_type=jnp.float32))           # (n_q, d_head)
        merged = jnp.concatenate(outs, axis=-1)                 # (n_q, D)
        return dense(merged, wo, bo)

    x2 = out_ref[0]                                             # (Lq, D) f32

    # ---------------- self attention + residual + LayerNorm 0 ----------------
    q = dense(x2, w_attn_ref[0, 0], b_attn_ref[0, 0]) * scale
    k = dense(x2, w_attn_ref[0, 1], b_attn_ref[0, 1])
    v = dense(x2, w_attn_ref[0, 2], b_attn_ref[0, 2])
    sa = mha(q, k, v, len_q, w_attn_ref[0, 3], b_attn_ref[0, 3])
    x2 = layer_norm(x2 + sa, ln_ref[0, 0], ln_ref[0, 1])

    # ---------------- cross attention + residual + LayerNorm 1 ---------------
    ek = ek_ref[0]
    ev = ev_ref[0]
    q = dense(x2, w_attn_ref[0, 4], b_attn_ref[0, 4]) * scale
    k = dense(ek, w_attn_ref[0, 5], b_attn_ref[0, 5])
    v = dense(ev, w_attn_ref[0, 6], b_attn_ref[0, 6])
    ca = mha(q, k, v, len_q, w_attn_ref[0, 7], b_attn_ref[0, 7])
    x2 = layer_norm(x2 + ca, ln_ref[0, 2], ln_ref[0, 3])

    # ---------------- feed-forward + residual + LayerNorm 2 ------------------
    h1 = jnp.maximum(dense(x2, w_ffn1_ref[0], b_ffn1_ref[0]), 0.0)     # ReLU
    ff = dense(h1, w_ffn2_ref[0], b_ffn2_ref[0])
    x2 = layer_norm(x2 + ff, ln_ref[0, 4], ln_ref[0, 5])

    out_ref[0] = x2


def _vocab_proj_kernel(x_ref, w_ref, b_ref, o_ref, *, compute_dtype):
    o_ref[...] = jax.lax.dot_general(
        x_ref[...].astype(compute_dtype), w_ref[...].astype(compute_dtype),
        (((1,), (0,)), ((), ())),
        preferred_element_type=jnp.float32) + b_ref[...]


# ------------------------------------------------------------ model wrappers

def _vmem_budget_bytes(len_q, len_kv, d_model, dim_ff):
    """Explicit VMEM budget: 2x per-layer weight block + activations + slack."""
    w_bytes = (8 * d_model * d_model + 2 * d_model * dim_ff) * 2     # bf16
    b_bytes = (8 * d_model + dim_ff + 7 * d_model) * 4
    act_bytes = (len_q * d_model + 2 * len_kv * d_model) * 4
    out_bytes = len_q * d_model * 4
    inter = (len_q * dim_ff + 8 * len_q * max(len_q, len_kv)) * 4
    est = 2 * (w_bytes + b_bytes) + 2 * (act_bytes + out_bytes) + inter
    est = 4 * est + (8 << 20)        # generous slack for compiler temporaries
    return max(16 << 20, min(est, 64 << 20))


def decoder_stack_pallas(x, enc_key, enc_val, params, *, num_heads,
                         compute_dtype=jnp.bfloat16):
    """x: (B, Lq, D); enc_key/enc_val: (B, Lk, D). Returns decoder output."""
    B, Lq, D = x.shape
    Lk = enc_key.shape[1]
    NL = params["w_attn"].shape[0]
    F = params["w_ffn1"].shape[-1]
    cd = compute_dtype

    kernel = functools.partial(_decoder_layer_kernel,
                               num_heads=num_heads, compute_dtype=cd)

    out = pl.pallas_call(
        kernel,
        out_shape=jax.ShapeDtypeStruct((B, Lq, D), jnp.float32),
        grid=(B, NL),
        in_specs=[
            pl.BlockSpec((1, Lq, D), lambda b, l: (b, 0, 0)),      # x0
            pl.BlockSpec((1, Lk, D), lambda b, l: (b, 0, 0)),      # encoder key
            pl.BlockSpec((1, Lk, D), lambda b, l: (b, 0, 0)),      # encoder val
            pl.BlockSpec((1, 8, D, D), lambda b, l: (l, 0, 0, 0)),  # attn w
            pl.BlockSpec((1, 8, 1, D), lambda b, l: (l, 0, 0, 0)),  # attn b
            pl.BlockSpec((1, D, F), lambda b, l: (l, 0, 0)),        # ffn w1
            pl.BlockSpec((1, 1, F), lambda b, l: (l, 0, 0)),        # ffn b1
            pl.BlockSpec((1, F, D), lambda b, l: (l, 0, 0)),        # ffn w2
            pl.BlockSpec((1, 1, D), lambda b, l: (l, 0, 0)),        # ffn b2
            pl.BlockSpec((1, 6, 1, D), lambda b, l: (l, 0, 0, 0)),  # LN g/b
        ],
        out_specs=pl.BlockSpec((1, Lq, D), lambda b, l: (b, 0, 0)),
        compiler_params=pltpu.CompilerParams(
            dimension_semantics=("parallel", "arbitrary"),
            vmem_limit_bytes=_vmem_budget_bytes(Lq, Lk, D, F)),
    )(x, enc_key, enc_val,
      params["w_attn"].astype(cd), params["b_attn"],
      params["w_ffn1"].astype(cd), params["b_ffn1"],
      params["w_ffn2"].astype(cd), params["b_ffn2"],
      params["ln"])
    return out


def vocab_projection_pallas(x2d, w, b, *, compute_dtype=jnp.bfloat16):
    """x2d: (M, D) @ w: (D, V) + b: (V,). V padded to 128-lane multiples."""
    M, D = x2d.shape
    V = w.shape[-1]

    Mp = _round_up(M, 8)
    TM = min(Mp, 256)
    Mp = _round_up(Mp, TM)
    Vp = _round_up(V, 128)           # lane-dense output: no masked stores
    TV = min(Vp, 512)
    Vp = _round_up(Vp, TV)

    xp = jnp.pad(x2d, ((0, Mp - M), (0, 0)))
    wp = jnp.pad(w, ((0, 0), (0, Vp - V))).astype(compute_dtype)
    bp = jnp.pad(b.reshape(1, V), ((0, 0), (0, Vp - V)))

    kernel = functools.partial(_vocab_proj_kernel, compute_dtype=compute_dtype)
    out = pl.pallas_call(
        kernel,
        out_shape=jax.ShapeDtypeStruct((Mp, Vp), jnp.float32),
        grid=(Mp // TM, Vp // TV),
        in_specs=[
            pl.BlockSpec((TM, D), lambda i, j: (i, 0)),
            pl.BlockSpec((D, TV), lambda i, j: (0, j)),
            pl.BlockSpec((1, TV), lambda i, j: (0, j)),
        ],
        out_specs=pl.BlockSpec((TM, TV), lambda i, j: (i, j)),
        compiler_params=pltpu.CompilerParams(
            dimension_semantics=("parallel", "parallel")),
    )(xp, wp, bp)
    return out[:M, :V]


def decoder_forward(params, decoder_input, encoder_output_2D, encoder_output_raw,
                    num_heads, compute_dtype=jnp.bfloat16):
    """Equivalent of Decoder.forward with all masks None, eval mode."""
    # TODO(synk): embedding gather + positional-encoding add stay in plain JAX
    # (data-dependent gather has no clean tiled BlockSpec form).
    x = params["embedding"][decoder_input]                     # (B, L, D)
    L = x.shape[1]
    x = x + params["pe"][:L]

    output = decoder_stack_pallas(
        x, encoder_output_2D, encoder_output_raw, params,
        num_heads=num_heads, compute_dtype=compute_dtype)      # (B, L, D)

    B, Lq, D = output.shape
    preds = vocab_projection_pallas(
        output.reshape(B * Lq, D), params["w_vocab"], params["b_vocab"],
        compute_dtype=compute_dtype)
    # final dropout == identity (eval); weights not returned (return_weights=False)
    return output, preds.reshape(B, Lq, -1), None


# ------------------------------------------------------------- param init

def make_positional_encoding(len_max, dim):
    div = jnp.exp(-jnp.arange(0.0, dim, 2) / dim * jnp.log(10000.0))
    l_pos = jnp.arange(0.0, len_max)[:, None] * div
    pe = jnp.zeros((len_max, dim), dtype=jnp.float32)
    pe = pe.at[:, ::2].set(jnp.sin(l_pos))
    pe = pe.at[:, 1::2].set(jnp.cos(l_pos))
    return pe


def init_params(key, num_dec_layers, d_model, dim_ff, max_seq_length, out_categories):
    """Per-layer weights stacked along a leading layer axis.

    attn weight order (axis 1): [self wq, wk, wv, wo, cross wq, wk, wv, wo]
    ln order (axis 1):          [g0, b0, g1, b1, g2, b2]
    Weights stored as (in, out); a real PyTorch checkpoint must be transposed.
    """
    s = 0.02
    D, F, NL, V = d_model, dim_ff, num_dec_layers, out_categories
    ks = jax.random.split(key, 5)
    params = {
        "w_attn": s * jax.random.normal(ks[0], (NL, 8, D, D), jnp.float32),
        "b_attn": jnp.zeros((NL, 8, 1, D), jnp.float32),
        "w_ffn1": s * jax.random.normal(ks[1], (NL, D, F), jnp.float32),
        "b_ffn1": jnp.zeros((NL, 1, F), jnp.float32),
        "w_ffn2": s * jax.random.normal(ks[2], (NL, F, D), jnp.float32),
        "b_ffn2": jnp.zeros((NL, 1, D), jnp.float32),
        "ln": jnp.zeros((NL, 6, 1, D), jnp.float32).at[:, 0::2].set(1.0),
        "embedding": s * jax.random.normal(ks[3], (V, D), jnp.float32),
        "pe": make_positional_encoding(max_seq_length, D),
        "w_vocab": s * jax.random.normal(ks[4], (D, V), jnp.float32),
        "b_vocab": jnp.zeros((V,), jnp.float32),
    }
    return params


# ----------------------------------------------------- pure-JAX reference

def reference_forward(params, decoder_input, enc_k, enc_v, num_heads):
    x = params["embedding"][decoder_input]
    x = x + params["pe"][: x.shape[1]]
    B, Lq, D = x.shape
    dh = D // num_heads

    def mha(q_in, k_in, v_in, w, b, base):
        q = q_in @ w[base + 0] + b[base + 0]
        k = k_in @ w[base + 1] + b[base + 1]
        v = v_in @ w[base + 2] + b[base + 2]

        def split(t):
            bt, lt, _ = t.shape
            return t.reshape(bt, lt, num_heads, dh).transpose(0, 2, 1, 3)

        qh, kh, vh = split(q), split(k), split(v)
        s = jnp.einsum("bhqd,bhkd->bhqk", qh, kh) * dh ** (-0.5)
        p = jax.nn.softmax(s, axis=-1)
        o = jnp.einsum("bhqk,bhkd->bhqd", p, vh)
        o = o.transpose(0, 2, 1, 3).reshape(B, -1, D)
        return o @ w[base + 3] + b[base + 3]

    def ln(y, g, beta):
        mu = y.mean(-1, keepdims=True)
        var = ((y - mu) ** 2).mean(-1, keepdims=True)
        return (y - mu) * jax.lax.rsqrt(var + 1e-5) * g + beta

    for l in range(params["w_attn"].shape[0]):
        w = params["w_attn"][l]
        b = params["b_attn"][l]
        lnp = params["ln"][l]
        x = ln(x + mha(x, x, x, w, b, 0), lnp[0], lnp[1])
        x = ln(x + mha(x, enc_k, enc_v, w, b, 4), lnp[2], lnp[3])
        h1 = jnp.maximum(x @ params["w_ffn1"][l] + params["b_ffn1"][l], 0.0)
        ff = h1 @ params["w_ffn2"][l] + params["b_ffn2"][l]
        x = ln(x + ff, lnp[4], lnp[5])
    preds = x @ params["w_vocab"] + params["b_vocab"]
    return x, preds


# ----------------------------------------------------------------- main

if __name__ == "__main__":
    # small config consistent with Decoder(__init__)
    num_dec_layers = 2
    d_model = 32
    dim_ff = 64
    n_heads = 4
    max_seq_length = 64
    out_categories = 40

    B, L_dec, L_enc = 2, 8, 16

    root = jax.random.PRNGKey(0)
    k_params, k_tok, k_e2d, k_eraw = jax.random.split(root, 4)

    params = init_params(k_params, num_dec_layers, d_model, dim_ff,
                         max_seq_length, out_categories)

    decoder_input = jax.random.randint(k_tok, (B, L_dec), 0, out_categories)
    encoder_output_2D = jax.random.normal(k_e2d, (B, L_enc, d_model), jnp.float32)
    encoder_output_raw = jax.random.normal(k_eraw, (B, L_enc, d_model), jnp.float32)

    fwd = jax.jit(functools.partial(decoder_forward, num_heads=n_heads))
    output, predictions, weights = fwd(
        params, decoder_input, encoder_output_2D, encoder_output_raw)
    jax.block_until_ready((output, predictions))

    assert output.shape == (B, L_dec, d_model)
    assert predictions.shape == (B, L_dec, out_categories)

    # numerical sanity vs. pure-JAX f32 reference (bf16-aware tolerance)
    ref_out, ref_pred = reference_forward(
        params, decoder_input, encoder_output_2D, encoder_output_raw, n_heads)
    np.testing.assert_allclose(np.asarray(output), np.asarray(ref_out),
                               rtol=5e-2, atol=5e-2)
    np.testing.assert_allclose(np.asarray(predictions), np.asarray(ref_pred),
                               rtol=5e-2, atol=5e-2)

    print("KERNEL_OK")
</pallas_src>

<mosaic_0001>
module attributes {stable_mosaic.version = 11 : i64} {
  func.func @_vocab_proj_kernel(%arg0: i32, %arg1: i32, %arg2: memref<16x32xf32, #tpu.memory_space<vmem>>, %arg3: memref<32x128xbf16, #tpu.memory_space<vmem>>, %arg4: memref<1x128xf32, #tpu.memory_space<vmem>>, %arg5: memref<16x128xf32, #tpu.memory_space<vmem>>) attributes {dimension_semantics = [#tpu.dimension_semantics<parallel>, #tpu.dimension_semantics<parallel>], iteration_bounds = array<i64: 1, 1>, scalar_prefetch = 0 : i64, scratch_operands = 0 : i64, tpu.core_type = #tpu.core_type<tc>, window_params = [{transform_indices = @transform_0, window_bounds = array<i64: 16, 32>}, {transform_indices = @transform_1, window_bounds = array<i64: 32, 128>}, {transform_indices = @transform_2, window_bounds = array<i64: 1, 128>}, {transform_indices = @transform_3, window_bounds = array<i64: 16, 128>}]} {
    %c0 = arith.constant 0 : index
    %c0_0 = arith.constant 0 : index
    %0 = vector.load %arg2[%c0, %c0_0] : memref<16x32xf32, #tpu.memory_space<vmem>>, vector<16x32xf32>
    %1 = arith.truncf %0 : vector<16x32xf32> to vector<16x32xbf16>
    %c0_1 = arith.constant 0 : index
    %c0_2 = arith.constant 0 : index
    %2 = vector.load %arg3[%c0_1, %c0_2] : memref<32x128xbf16, #tpu.memory_space<vmem>>, vector<32x128xbf16>
    %cst = arith.constant dense<0.000000e+00> : vector<16x128xf32>
    %3 = tpu.matmul %1, %2, %cst {dimension_numbers = #tpu.dot_dimension_numbers<[1], [0], [0], [1], [0, 0, 1, 1], [], []>} : vector<16x32xbf16>, vector<32x128xbf16>, vector<16x128xf32> -> vector<16x128xf32>
    %c0_3 = arith.constant 0 : index
    %c0_4 = arith.constant 0 : index
    %4 = vector.load %arg4[%c0_3, %c0_4] : memref<1x128xf32, #tpu.memory_space<vmem>>, vector<1x128xf32>
    %5 = vector.broadcast %4 : vector<1x128xf32> to vector<16x128xf32>
    %6 = arith.addf %3, %5 : vector<16x128xf32>
    %c0_5 = arith.constant 0 : index
    %c0_6 = arith.constant 0 : index
    %7 = vector.load %arg5[%c0_5, %c0_6] : memref<16x128xf32, #tpu.memory_space<vmem>>, vector<16x128xf32>
    tpu.vector_store %arg5[%c0_5, %c0_6], %6 {strides = array<i32>} : memref<16x128xf32, #tpu.memory_space<vmem>>, vector<16x128xf32>,
    return
  }
  func.func @transform_0(%arg0: i32, %arg1: i32) -> (i32, i32) {
    %c0_i32 = arith.constant 0 : i32
    %c0_i32_0 = arith.constant 0 : i32
    return %arg0, %c0_i32 : i32, i32
  }
  func.func @transform_1(%arg0: i32, %arg1: i32) -> (i32, i32) {
    %c0_i32 = arith.constant 0 : i32
    %c0_i32_0 = arith.constant 0 : i32
    return %c0_i32, %arg1 : i32, i32
  }
  func.func @transform_2(%arg0: i32, %arg1: i32) -> (i32, i32) {
    %c0_i32 = arith.constant 0 : i32
    %c0_i32_0 = arith.constant 0 : i32
    return %c0_i32, %arg1 : i32, i32
  }
  func.func @transform_3(%arg0: i32, %arg1: i32) -> (i32, i32) {
    %c0_i32 = arith.constant 0 : i32
    return %arg0, %arg1 : i32, i32
  }
}

module attributes {stable_mosaic.version = 11 : i64} {
  func.func @_decoder_layer_kernel(%arg0: i32, %arg1: i32, %arg2: memref<1x8x32xf32, #tpu.memory_space<vmem>>, %arg3: memref<1x16x32xf32, #tpu.memory_space<vmem>>, %arg4: memref<1x16x32xf32, #tpu.memory_space<vmem>>, %arg5: memref<1x8x32x32xbf16, #tpu.memory_space<vmem>>, %arg6: memref<1x8x1x32xf32, #tpu.memory_space<vmem>>, %arg7: memref<1x32x64xbf16, #tpu.memory_space<vmem>>, %arg8: memref<1x1x64xf32, #tpu.memory_space<vmem>>, %arg9: memref<1x64x32xbf16, #tpu.memory_space<vmem>>, %arg10: memref<1x1x32xf32, #tpu.memory_space<vmem>>, %arg11: memref<1x6x1x32xf32, #tpu.memory_space<vmem>>, %arg12: memref<1x8x32xf32, #tpu.memory_space<vmem>>) attributes {dimension_semantics = [#tpu.dimension_semantics<parallel>, #tpu.dimension_semantics<arbitrary>], iteration_bounds = array<i64: 2, 2>, scalar_prefetch = 0 : i64, scratch_operands = 0 : i64, tpu.core_type = #tpu.core_type<tc>, window_params = [{transform_indices = @transform_0, window_bounds = array<i64: 1, 8, 32>}, {transform_indices = @transform_1, window_bounds = array<i64: 1, 16, 32>}, {transform_indices = @transform_2, window_bounds = array<i64: 1, 16, 32>}, {transform_indices = @transform_3, window_bounds = array<i64: 1, 8, 32, 32>}, {transform_indices = @transform_4, window_bounds = array<i64: 1, 8, 1, 32>}, {transform_indices = @transform_5, window_bounds = array<i64: 1, 32, 64>}, {transform_indices = @transform_6, window_bounds = array<i64: 1, 1, 64>}, {transform_indices = @transform_7, window_bounds = array<i64: 1, 64, 32>}, {transform_indices = @transform_8, window_bounds = array<i64: 1, 1, 32>}, {transform_indices = @transform_9, window_bounds = array<i64: 1, 6, 1, 32>}, {transform_indices = @transform_10, window_bounds = array<i64: 1, 8, 32>}]} {
    %c0_i32 = arith.constant 0 : i32
    %0 = arith.cmpi eq, %arg1, %c0_i32 : i32
    %1 = arith.extui %0 : i1 to i32
    %c0_i32_0 = arith.constant 0 : i32
    %2 = arith.cmpi ne, %1, %c0_i32_0 : i32
    scf.if %2 {
      %c0_152 = arith.constant 0 : index
      %c0_153 = arith.constant 0 : index
      %c0_154 = arith.constant 0 : index
      %265 = vector.load %arg2[%c0_152, %c0_153, %c0_154] : memref<1x8x32xf32, #tpu.memory_space<vmem>>, vector<1x8x32xf32>
      %c0_155 = arith.constant 0 : index
      %c0_156 = arith.constant 0 : index
      %c0_157 = arith.constant 0 : index
      %266 = vector.load %arg12[%c0_155, %c0_156, %c0_157] : memref<1x8x32xf32, #tpu.memory_space<vmem>>, vector<1x8x32xf32>
      tpu.vector_store %arg12[%c0_155, %c0_156, %c0_157], %265 {strides = array<i32>} : memref<1x8x32xf32, #tpu.memory_space<vmem>>, vector<1x8x32xf32>,
    } else {
    }
    %c0 = arith.constant 0 : index
    %c0_1 = arith.constant 0 : index
    %c0_2 = arith.constant 0 : index
    %3 = vector.load %arg12[%c0, %c0_1, %c0_2] : memref<1x8x32xf32, #tpu.memory_space<vmem>>, vector<1x8x32xf32>
    %4 = vector.shape_cast %3 : vector<1x8x32xf32> to vector<8x32xf32>
    %c0_3 = arith.constant 0 : index
    %c0_4 = arith.constant 0 : index
    %c0_5 = arith.constant 0 : index
    %c0_6 = arith.constant 0 : index
    %5 = vector.load %arg5[%c0_3, %c0_4, %c0_5, %c0_6] : memref<1x8x32x32xbf16, #tpu.memory_space<vmem>>, vector<1x1x32x32xbf16>
    %6 = vector.shape_cast %5 : vector<1x1x32x32xbf16> to vector<32x32xbf16>
    %c0_7 = arith.constant 0 : index
    %c0_8 = arith.constant 0 : index
    %c0_9 = arith.constant 0 : index
    %c0_10 = arith.constant 0 : index
    %7 = vector.load %arg6[%c0_7, %c0_8, %c0_9, %c0_10] : memref<1x8x1x32xf32, #tpu.memory_space<vmem>>, vector<1x1x1x32xf32>
    %8 = vector.shape_cast %7 : vector<1x1x1x32xf32> to vector<1x32xf32>
    %9 = arith.truncf %4 : vector<8x32xf32> to vector<8x32xbf16>
    %cst = arith.constant dense<0.000000e+00> : vector<8x32xf32>
    %10 = tpu.matmul %9, %6, %cst {dimension_numbers = #tpu.dot_dimension_numbers<[1], [0], [0], [1], [0, 0, 1, 1], [], []>} : vector<8x32xbf16>, vector<32x32xbf16>, vector<8x32xf32> -> vector<8x32xf32>
    %11 = vector.broadcast %8 : vector<1x32xf32> to vector<8x32xf32>
    %12 = arith.addf %10, %11 : vector<8x32xf32>
    %cst_11 = arith.constant 0.353553385 : f32
    %13 = vector.broadcast %cst_11 : f32 to vector<8x32xf32>
    %14 = arith.mulf %12, %13 : vector<8x32xf32>
    %c0_12 = arith.constant 0 : index
    %c1 = arith.constant 1 : index
    %c0_13 = arith.constant 0 : index
    %c0_14 = arith.constant 0 : index
    %15 = vector.load %arg5[%c0_12, %c1, %c0_13, %c0_14] : memref<1x8x32x32xbf16, #tpu.memory_space<vmem>>, vector<1x1x32x32xbf16>
    %16 = vector.shape_cast %15 : vector<1x1x32x32xbf16> to vector<32x32xbf16>
    %c0_15 = arith.constant 0 : index
    %c1_16 = arith.constant 1 : index
    %c0_17 = arith.constant 0 : index
    %c0_18 = arith.constant 0 : index
    %17 = vector.load %arg6[%c0_15, %c1_16, %c0_17, %c0_18] : memref<1x8x1x32xf32, #tpu.memory_space<vmem>>, vector<1x1x1x32xf32>
    %18 = vector.shape_cast %17 : vector<1x1x1x32xf32> to vector<1x32xf32>
    %19 = arith.truncf %4 : vector<8x32xf32> to vector<8x32xbf16>
    %cst_19 = arith.constant dense<0.000000e+00> : vector<8x32xf32>
    %20 = tpu.matmul %19, %16, %cst_19 {dimension_numbers = #tpu.dot_dimension_numbers<[1], [0], [0], [1], [0, 0, 1, 1], [], []>} : vector<8x32xbf16>, vector<32x32xbf16>, vector<8x32xf32> -> vector<8x32xf32>
    %21 = vector.broadcast %18 : vector<1x32xf32> to vector<8x32xf32>
    %22 = arith.addf %20, %21 : vector<8x32xf32>
    %c0_20 = arith.constant 0 : index
    %c2 = arith.constant 2 : index
    %c0_21 = arith.constant 0 : index
    %c0_22 = arith.constant 0 : index
    %23 = vector.load %arg5[%c0_20, %c2, %c0_21, %c0_22] : memref<1x8x32x32xbf16, #tpu.memory_space<vmem>>, vector<1x1x32x32xbf16>
    %24 = vector.shape_cast %23 : vector<1x1x32x32xbf16> to vector<32x32xbf16>
    %c0_23 = arith.constant 0 : index
    %c2_24 = arith.constant 2 : index
    %c0_25 = arith.constant 0 : index
    %c0_26 = arith.constant 0 : index
    %25 = vector.load %arg6[%c0_23, %c2_24, %c0_25, %c0_26] : memref<1x8x1x32xf32, #tpu.memory_space<vmem>>, vector<1x1x1x32xf32>
    %26 = vector.shape_cast %25 : vector<1x1x1x32xf32> to vector<1x32xf32>
    %27 = arith.truncf %4 : vector<8x32xf32> to vector<8x32xbf16>
    %cst_27 = arith.constant dense<0.000000e+00> : vector<8x32xf32>
    %28 = tpu.matmul %27, %24, %cst_27 {dimension_numbers = #tpu.dot_dimension_numbers<[1], [0], [0], [1], [0, 0, 1, 1], [], []>} : vector<8x32xbf16>, vector<32x32xbf16>, vector<8x32xf32> -> vector<8x32xf32>
    %29 = vector.broadcast %26 : vector<1x32xf32> to vector<8x32xf32>
    %30 = arith.addf %28, %29 : vector<8x32xf32>
    %c0_28 = arith.constant 0 : index
    %c3 = arith.constant 3 : index
    %c0_29 = arith.constant 0 : index
    %c0_30 = arith.constant 0 : index
    %31 = vector.load %arg5[%c0_28, %c3, %c0_29, %c0_30] : memref<1x8x32x32xbf16, #tpu.memory_space<vmem>>, vector<1x1x32x32xbf16>
    %32 = vector.shape_cast %31 : vector<1x1x32x32xbf16> to vector<32x32xbf16>
    %c0_31 = arith.constant 0 : index
    %c3_32 = arith.constant 3 : index
    %c0_33 = arith.constant 0 : index
    %c0_34 = arith.constant 0 : index
    %33 = vector.load %arg6[%c0_31, %c3_32, %c0_33, %c0_34] : memref<1x8x1x32xf32, #tpu.memory_space<vmem>>, vector<1x1x1x32xf32>
    %34 = vector.shape_cast %33 : vector<1x1x1x32xf32> to vector<1x32xf32>
    %35 = arith.truncf %22 : vector<8x32xf32> to vector<8x32xbf16>
    %36 = arith.truncf %30 : vector<8x32xf32> to vector<8x32xbf16>
    %37 = vector.extract_strided_slice %14 {offsets = [0, 0], sizes = [8, 8], strides = [1, 1]} : vector<8x32xf32> to vector<8x8xf32>
    %38 = arith.truncf %37 : vector<8x8xf32> to vector<8x8xbf16>
    %39 = vector.extract_strided_slice %35 {offsets = [0, 0], sizes = [8, 8], strides = [1, 1]} : vector<8x32xbf16> to vector<8x8xbf16>
    %cst_35 = arith.constant dense<0.000000e+00> : vector<8x8xf32>
    %40 = tpu.matmul %38, %39, %cst_35 {dimension_numbers = #tpu.dot_dimension_numbers<[1], [1], [0], [0], [0, 0, 1, 0], [], []>} : vector<8x8xbf16>, vector<8x8xbf16>, vector<8x8xf32> -> vector<8x8xf32>
    %41 = vector.extract_strided_slice %14 {offsets = [0, 8], sizes = [8, 8], strides = [1, 1]} : vector<8x32xf32> to vector<8x8xf32>
    %42 = arith.truncf %41 : vector<8x8xf32> to vector<8x8xbf16>
    %43 = vector.extract_strided_slice %35 {offsets = [0, 8], sizes = [8, 8], strides = [1, 1]} : vector<8x32xbf16> to vector<8x8xbf16>
    %cst_36 = arith.constant dense<0.000000e+00> : vector<8x8xf32>
    %44 = tpu.matmul %42, %43, %cst_36 {dimension_numbers = #tpu.dot_dimension_numbers<[1], [1], [0], [0], [0, 0, 1, 0], [], []>} : vector<8x8xbf16>, vector<8x8xbf16>, vector<8x8xf32> -> vector<8x8xf32>
    %45 = vector.extract_strided_slice %14 {offsets = [0, 16], sizes = [8, 8], strides = [1, 1]} : vector<8x32xf32> to vector<8x8xf32>
    %46 = arith.truncf %45 : vector<8x8xf32> to vector<8x8xbf16>
    %47 = vector.extract_strided_slice %35 {offsets = [0, 16], sizes = [8, 8], strides = [1, 1]} : vector<8x32xbf16> to vector<8x8xbf16>
    %cst_37 = arith.constant dense<0.000000e+00> : vector<8x8xf32>
    %48 = tpu.matmul %46, %47, %cst_37 {dimension_numbers = #tpu.dot_dimension_numbers<[1], [1], [0], [0], [0, 0, 1, 0], [], []>} : vector<8x8xbf16>, vector<8x8xbf16>, vector<8x8xf32> -> vector<8x8xf32>
    %49 = vector.extract_strided_slice %14 {offsets = [0, 24], sizes = [8, 8], strides = [1, 1]} : vector<8x32xf32> to vector<8x8xf32>
    %50 = arith.truncf %49 : vector<8x8xf32> to vector<8x8xbf16>
    %51 = vector.extract_strided_slice %35 {offsets = [0, 24], sizes = [8, 8], strides = [1, 1]} : vector<8x32xbf16> to vector<8x8xbf16>
    %cst_38 = arith.constant dense<0.000000e+00> : vector<8x8xf32>
    %52 = tpu.matmul %50, %51, %cst_38 {dimension_numbers = #tpu.dot_dimension_numbers<[1], [1], [0], [0], [0, 0, 1, 0], [], []>} : vector<8x8xbf16>, vector<8x8xbf16>, vector<8x8xf32> -> vector<8x8xf32>
    %53 = tpu.concatenate %40, %44, %48, %52 in 0 : vector<8x8xf32>, vector<8x8xf32>, vector<8x8xf32>, vector<8x8xf32> -> vector<32x8xf32>
    %cst_39 = arith.constant dense<0xFF800000> : vector<32xf32>
    %54 = vector.multi_reduction <maximumf>, %53, %cst_39 [1] : vector<32x8xf32> to vector<32xf32>
    %55 = vector.shape_cast %54 : vector<32xf32> to vector<32x1xf32>
    %56 = vector.broadcast %55 : vector<32x1xf32> to vector<32x8xf32>
    %57 = arith.subf %53, %56 : vector<32x8xf32>
    %58 = math.exp %57 : vector<32x8xf32>
    %cst_40 = arith.constant dense<0.000000e+00> : vector<32xf32>
    %59 = vector.multi_reduction <add>, %58, %cst_40 [1] : vector<32x8xf32> to vector<32xf32>
    %60 = vector.shape_cast %59 : vector<32xf32> to vector<32x1xf32>
    %61 = tpu.reciprocal %60 {approx = true} : vector<32x1xf32> -> vector<32x1xf32>
    %62 = vector.broadcast %61 : vector<32x1xf32> to vector<32x8xf32>
    %63 = arith.mulf %58, %62 : vector<32x8xf32>
    %64 = arith.truncf %63 : vector<32x8xf32> to vector<32x8xbf16>
    %65 = vector.extract_strided_slice %64 {offsets = [0, 0], sizes = [8, 8], strides = [1, 1]} : vector<32x8xbf16> to vector<8x8xbf16>
    %66 = vector.extract_strided_slice %36 {offsets = [0, 0], sizes = [8, 8], strides = [1, 1]} : vector<8x32xbf16> to vector<8x8xbf16>
    %cst_41 = arith.constant dense<0.000000e+00> : vector<8x8xf32>
    %67 = tpu.matmul %65, %66, %cst_41 {dimension_numbers = #tpu.dot_dimension_numbers<[1], [0], [0], [1], [0, 0, 1, 1], [], []>} : vector<8x8xbf16>, vector<8x8xbf16>, vector<8x8xf32> -> vector<8x8xf32>
    %68 = vector.extract_strided_slice %64 {offsets = [8, 0], sizes = [8, 8], strides = [1, 1]} : vector<32x8xbf16> to vector<8x8xbf16>
    %69 = vector.extract_strided_slice %36 {offsets = [0, 8], sizes = [8, 8], strides = [1, 1]} : vector<8x32xbf16> to vector<8x8xbf16>
    %cst_42 = arith.constant dense<0.000000e+00> : vector<8x8xf32>
    %70 = tpu.matmul %68, %69, %cst_42 {dimension_numbers = #tpu.dot_dimension_numbers<[1], [0], [0], [1], [0, 0, 1, 1], [], []>} : vector<8x8xbf16>, vector<8x8xbf16>, vector<8x8xf32> -> vector<8x8xf32>
    %71 = vector.extract_strided_slice %64 {offsets = [16, 0], sizes = [8, 8], strides = [1, 1]} : vector<32x8xbf16> to vector<8x8xbf16>
    %72 = vector.extract_strided_slice %36 {offsets = [0, 16], sizes = [8, 8], strides = [1, 1]} : vector<8x32xbf16> to vector<8x8xbf16>
    %cst_43 = arith.constant dense<0.000000e+00> : vector<8x8xf32>
    %73 = tpu.matmul %71, %72, %cst_43 {dimension_numbers = #tpu.dot_dimension_numbers<[1], [0], [0], [1], [0, 0, 1, 1], [], []>} : vector<8x8xbf16>, vector<8x8xbf16>, vector<8x8xf32> -> vector<8x8xf32>
    %74 = vector.extract_strided_slice %64 {offsets = [24, 0], sizes = [8, 8], strides = [1, 1]} : vector<32x8xbf16> to vector<8x8xbf16>
    %75 = vector.extract_strided_slice %36 {offsets = [0, 24], sizes = [8, 8], strides = [1, 1]} : vector<8x32xbf16> to vector<8x8xbf16>
    %cst_44 = arith.constant dense<0.000000e+00> : vector<8x8xf32>
    %76 = tpu.matmul %74, %75, %cst_44 {dimension_numbers = #tpu.dot_dimension_numbers<[1], [0], [0], [1], [0, 0, 1, 1], [], []>} : vector<8x8xbf16>, vector<8x8xbf16>, vector<8x8xf32> -> vector<8x8xf32>
    %77 = tpu.concatenate %67, %70, %73, %76 in 1 : vector<8x8xf32>, vector<8x8xf32>, vector<8x8xf32>, vector<8x8xf32> -> vector<8x32xf32>
    %78 = arith.truncf %77 : vector<8x32xf32> to vector<8x32xbf16>
    %cst_45 = arith.constant dense<0.000000e+00> : vector<8x32xf32>
    %79 = tpu.matmul %78, %32, %cst_45 {dimension_numbers = #tpu.dot_dimension_numbers<[1], [0], [0], [1], [0, 0, 1, 1], [], []>} : vector<8x32xbf16>, vector<32x32xbf16>, vector<8x32xf32> -> vector<8x32xf32>
    %80 = vector.broadcast %34 : vector<1x32xf32> to vector<8x32xf32>
    %81 = arith.addf %79, %80 : vector<8x32xf32>
    %82 = arith.addf %4, %81 : vector<8x32xf32>
    %c0_46 = arith.constant 0 : index
    %c0_47 = arith.constant 0 : index
    %c0_48 = arith.constant 0 : index
    %c0_49 = arith.constant 0 : index
    %83 = vector.load %arg11[%c0_46, %c0_47, %c0_48, %c0_49] : memref<1x6x1x32xf32, #tpu.memory_space<vmem>>, vector<1x1x1x32xf32>
    %84 = vector.shape_cast %83 : vector<1x1x1x32xf32> to vector<1x32xf32>
    %c0_50 = arith.constant 0 : index
    %c1_51 = arith.constant 1 : index
    %c0_52 = arith.constant 0 : index
    %c0_53 = arith.constant 0 : index
    %85 = vector.load %arg11[%c0_50, %c1_51, %c0_52, %c0_53] : memref<1x6x1x32xf32, #tpu.memory_space<vmem>>, vector<1x1x1x32xf32>
    %86 = vector.shape_cast %85 : vector<1x1x1x32xf32> to vector<1x32xf32>
    %cst_54 = arith.constant dense<0.000000e+00> : vector<8xf32>
    %87 = vector.multi_reduction <add>, %82, %cst_54 [1] : vector<8x32xf32> to vector<8xf32>
    %88 = vector.shape_cast %87 : vector<8xf32> to vector<8x1xf32>
    %cst_55 = arith.constant 3.200000e+01 : f32
    %89 = vector.broadcast %cst_55 : f32 to vector<8x1xf32>
    %90 = arith.divf %88, %89 : vector<8x1xf32>
    %91 = vector.broadcast %90 : vector<8x1xf32> to vector<8x32xf32>
    %92 = arith.subf %82, %91 : vector<8x32xf32>
    %93 = arith.mulf %92, %92 : vector<8x32xf32>
    %cst_56 = arith.constant dense<0.000000e+00> : vector<8xf32>
    %94 = vector.multi_reduction <add>, %93, %cst_56 [1] : vector<8x32xf32> to vector<8xf32>
    %95 = vector.shape_cast %94 : vector<8xf32> to vector<8x1xf32>
    %cst_57 = arith.constant 3.200000e+01 : f32
    %96 = vector.broadcast %cst_57 : f32 to vector<8x1xf32>
    %97 = arith.divf %95, %96 : vector<8x1xf32>
    %98 = vector.broadcast %90 : vector<8x1xf32> to vector<8x32xf32>
    %99 = arith.subf %82, %98 : vector<8x32xf32>
    %cst_58 = arith.constant 9.99999974E-6 : f32
    %100 = vector.broadcast %cst_58 : f32 to vector<8x1xf32>
    %101 = arith.addf %97, %100 : vector<8x1xf32>
    %102 = math.rsqrt %101 : vector<8x1xf32>
    %103 = vector.broadcast %102 : vector<8x1xf32> to vector<8x32xf32>
    %104 = arith.mulf %99, %103 : vector<8x32xf32>
    %105 = vector.broadcast %84 : vector<1x32xf32> to vector<8x32xf32>
    %106 = arith.mulf %104, %105 : vector<8x32xf32>
    %107 = vector.broadcast %86 : vector<1x32xf32> to vector<8x32xf32>
    %108 = arith.addf %106, %107 : vector<8x32xf32>
    %c0_59 = arith.constant 0 : index
    %c0_60 = arith.constant 0 : index
    %c0_61 = arith.constant 0 : index
    %109 = vector.load %arg3[%c0_59, %c0_60, %c0_61] : memref<1x16x32xf32, #tpu.memory_space<vmem>>, vector<1x16x32xf32>
    %110 = vector.shape_cast %109 : vector<1x16x32xf32> to vector<16x32xf32>
    %c0_62 = arith.constant 0 : index
    %c0_63 = arith.constant 0 : index
    %c0_64 = arith.constant 0 : index
    %111 = vector.load %arg4[%c0_62, %c0_63, %c0_64] : memref<1x16x32xf32, #tpu.memory_space<vmem>>, vector<1x16x32xf32>
    %112 = vector.shape_cast %111 : vector<1x16x32xf32> to vector<16x32xf32>
    %c0_65 = arith.constant 0 : index
    %c4 = arith.constant 4 : index
    %c0_66 = arith.constant 0 : index
    %c0_67 = arith.constant 0 : index
    %113 = vector.load %arg5[%c0_65, %c4, %c0_66, %c0_67] : memref<1x8x32x32xbf16, #tpu.memory_space<vmem>>, vector<1x1x32x32xbf16>
    %114 = vector.shape_cast %113 : vector<1x1x32x32xbf16> to vector<32x32xbf16>
    %c0_68 = arith.constant 0 : index
    %c4_69 = arith.constant 4 : index
    %c0_70 = arith.constant 0 : index
    %c0_71 = arith.constant 0 : index
    %115 = vector.load %arg6[%c0_68, %c4_69, %c0_70, %c0_71] : memref<1x8x1x32xf32, #tpu.memory_space<vmem>>, vector<1x1x1x32xf32>
    %116 = vector.shape_cast %115 : vector<1x1x1x32xf32> to vector<1x32xf32>
    %117 = arith.truncf %108 : vector<8x32xf32> to vector<8x32xbf16>
    %cst_72 = arith.constant dense<0.000000e+00> : vector<8x32xf32>
    %118 = tpu.matmul %117, %114, %cst_72 {dimension_numbers = #tpu.dot_dimension_numbers<[1], [0], [0], [1], [0, 0, 1, 1], [], []>} : vector<8x32xbf16>, vector<32x32xbf16>, vector<8x32xf32> -> vector<8x32xf32>
    %119 = vector.broadcast %116 : vector<1x32xf32> to vector<8x32xf32>
    %120 = arith.addf %118, %119 : vector<8x32xf32>
    %cst_73 = arith.constant 0.353553385 : f32
    %121 = vector.broadcast %cst_73 : f32 to vector<8x32xf32>
    %122 = arith.mulf %120, %121 : vector<8x32xf32>
    %c0_74 = arith.constant 0 : index
    %c5 = arith.constant 5 : index
    %c0_75 = arith.constant 0 : index
    %c0_76 = arith.constant 0 : index
    %123 = vector.load %arg5[%c0_74, %c5, %c0_75, %c0_76] : memref<1x8x32x32xbf16, #tpu.memory_space<vmem>>, vector<1x1x32x32xbf16>
    %124 = vector.shape_cast %123 : vector<1x1x32x32xbf16> to vector<32x32xbf16>
    %c0_77 = arith.constant 0 : index
    %c5_78 = arith.constant 5 : index
    %c0_79 = arith.constant 0 : index
    %c0_80 = arith.constant 0 : index
    %125 = vector.load %arg6[%c0_77, %c5_78, %c0_79, %c0_80] : memref<1x8x1x32xf32, #tpu.memory_space<vmem>>, vector<1x1x1x32xf32>
    %126 = vector.shape_cast %125 : vector<1x1x1x32xf32> to vector<1x32xf32>
    %127 = arith.truncf %110 : vector<16x32xf32> to vector<16x32xbf16>
    %cst_81 = arith.constant dense<0.000000e+00> : vector<16x32xf32>
    %128 = tpu.matmul %127, %124, %cst_81 {dimension_numbers = #tpu.dot_dimension_numbers<[1], [0], [0], [1], [0, 0, 1, 1], [], []>} : vector<16x32xbf16>, vector<32x32xbf16>, vector<16x32xf32> -> vector<16x32xf32>
    %129 = vector.broadcast %126 : vector<1x32xf32> to vector<16x32xf32>
    %130 = arith.addf %128, %129 : vector<16x32xf32>
    %c0_82 = arith.constant 0 : index
    %c6 = arith.constant 6 : index
    %c0_83 = arith.constant 0 : index
    %c0_84 = arith.constant 0 : index
    %131 = vector.load %arg5[%c0_82, %c6, %c0_83, %c0_84] : memref<1x8x32x32xbf16, #tpu.memory_space<vmem>>, vector<1x1x32x32xbf16>
    %132 = vector.shape_cast %131 : vector<1x1x32x32xbf16> to vector<32x32xbf16>
    %c0_85 = arith.constant 0 : index
    %c6_86 = arith.constant 6 : index
    %c0_87 = arith.constant 0 : index
    %c0_88 = arith.constant 0 : index
    %133 = vector.load %arg6[%c0_85, %c6_86, %c0_87, %c0_88] : memref<1x8x1x32xf32, #tpu.memory_space<vmem>>, vector<1x1x1x32xf32>
    %134 = vector.shape_cast %133 : vector<1x1x1x32xf32> to vector<1x32xf32>
    %135 = arith.truncf %112 : vector<16x32xf32> to vector<16x32xbf16>
    %cst_89 = arith.constant dense<0.000000e+00> : vector<16x32xf32>
    %136 = tpu.matmul %135, %132, %cst_89 {dimension_numbers = #tpu.dot_dimension_numbers<[1], [0], [0], [1], [0, 0, 1, 1], [], []>} : vector<16x32xbf16>, vector<32x32xbf16>, vector<16x32xf32> -> vector<16x32xf32>
    %137 = vector.broadcast %134 : vector<1x32xf32> to vector<16x32xf32>
    %138 = arith.addf %136, %137 : vector<16x32xf32>
    %c0_90 = arith.constant 0 : index
    %c7 = arith.constant 7 : index
    %c0_91 = arith.constant 0 : index
    %c0_92 = arith.constant 0 : index
    %139 = vector.load %arg5[%c0_90, %c7, %c0_91, %c0_92] : memref<1x8x32x32xbf16, #tpu.memory_space<vmem>>, vector<1x1x32x32xbf16>
    %140 = vector.shape_cast %139 : vector<1x1x32x32xbf16> to vector<32x32xbf16>
    %c0_93 = arith.constant 0 : index
    %c7_94 = arith.constant 7 : index
    %c0_95 = arith.constant 0 : index
    %c0_96 = arith.constant 0 : index
    %141 = vector.load %arg6[%c0_93, %c7_94, %c0_95, %c0_96] : memref<1x8x1x32xf32, #tpu.memory_space<vmem>>, vector<1x1x1x32xf32>
    %142 = vector.shape_cast %141 : vector<1x1x1x32xf32> to vector<1x32xf32>
    %143 = arith.truncf %130 : vector<16x32xf32> to vector<16x32xbf16>
    %144 = arith.truncf %138 : vector<16x32xf32> to vector<16x32xbf16>
    %145 = vector.extract_strided_slice %122 {offsets = [0, 0], sizes = [8, 8], strides = [1, 1]} : vector<8x32xf32> to vector<8x8xf32>
    %146 = arith.truncf %145 : vector<8x8xf32> to vector<8x8xbf16>
    %147 = vector.extract_strided_slice %143 {offsets = [0, 0], sizes = [16, 8], strides = [1, 1]} : vector<16x32xbf16> to vector<16x8xbf16>
    %cst_97 = arith.constant dense<0.000000e+00> : vector<8x16xf32>
    %148 = tpu.matmul %146, %147, %cst_97 {dimension_numbers = #tpu.dot_dimension_numbers<[1], [1], [0], [0], [0, 0, 1, 0], [], []>} : vector<8x8xbf16>, vector<16x8xbf16>, vector<8x16xf32> -> vector<8x16xf32>
    %149 = vector.extract_strided_slice %122 {offsets = [0, 8], sizes = [8, 8], strides = [1, 1]} : vector<8x32xf32> to vector<8x8xf32>
    %150 = arith.truncf %149 : vector<8x8xf32> to vector<8x8xbf16>
    %151 = vector.extract_strided_slice %143 {offsets = [0, 8], sizes = [16, 8], strides = [1, 1]} : vector<16x32xbf16> to vector<16x8xbf16>
    %cst_98 = arith.constant dense<0.000000e+00> : vector<8x16xf32>
    %152 = tpu.matmul %150, %151, %cst_98 {dimension_numbers = #tpu.dot_dimension_numbers<[1], [1], [0], [0], [0, 0, 1, 0], [], []>} : vector<8x8xbf16>, vector<16x8xbf16>, vector<8x16xf32> -> vector<8x16xf32>
    %153 = vector.extract_strided_slice %122 {offsets = [0, 16], sizes = [8, 8], strides = [1, 1]} : vector<8x32xf32> to vector<8x8xf32>
    %154 = arith.truncf %153 : vector<8x8xf32> to vector<8x8xbf16>
    %155 = vector.extract_strided_slice %143 {offsets = [0, 16], sizes = [16, 8], strides = [1, 1]} : vector<16x32xbf16> to vector<16x8xbf16>
    %cst_99 = arith.constant dense<0.000000e+00> : vector<8x16xf32>
    %156 = tpu.matmul %154, %155, %cst_99 {dimension_numbers = #tpu.dot_dimension_numbers<[1], [1], [0], [0], [0, 0, 1, 0], [], []>} : vector<8x8xbf16>, vector<16x8xbf16>, vector<8x16xf32> -> vector<8x16xf32>
    %157 = vector.extract_strided_slice %122 {offsets = [0, 24], sizes = [8, 8], strides = [1, 1]} : vector<8x32xf32> to vector<8x8xf32>
    %158 = arith.truncf %157 : vector<8x8xf32> to vector<8x8xbf16>
    %159 = vector.extract_strided_slice %143 {offsets = [0, 24], sizes = [16, 8], strides = [1, 1]} : vector<16x32xbf16> to vector<16x8xbf16>
    %cst_100 = arith.constant dense<0.000000e+00> : vector<8x16xf32>
    %160 = tpu.matmul %158, %159, %cst_100 {dimension_numbers = #tpu.dot_dimension_numbers<[1], [1], [0], [0], [0, 0, 1, 0], [], []>} : vector<8x8xbf16>, vector<16x8xbf16>, vector<8x16xf32> -> vector<8x16xf32>
    %161 = tpu.concatenate %148, %152, %156, %160 in 0 : vector<8x16xf32>, vector<8x16xf32>, vector<8x16xf32>, vector<8x16xf32> -> vector<32x16xf32>
    %cst_101 = arith.constant dense<0xFF800000> : vector<32xf32>
    %162 = vector.multi_reduction <maximumf>, %161, %cst_101 [1] : vector<32x16xf32> to vector<32xf32>
    %163 = vector.shape_cast %162 : vector<32xf32> to vector<32x1xf32>
    %164 = vector.broadcast %163 : vector<32x1xf32> to vector<32x16xf32>
    %165 = arith.subf %161, %164 : vector<32x16xf32>
    %166 = math.exp %165 : vector<32x16xf32>
    %cst_102 = arith.constant dense<0.000000e+00> : vector<32xf32>
    %167 = vector.multi_reduction <add>, %166, %cst_102 [1] : vector<32x16xf32> to vector<32xf32>
    %168 = vector.shape_cast %167 : vector<32xf32> to vector<32x1xf32>
    %169 = tpu.reciprocal %168 {approx = true} : vector<32x1xf32> -> vector<32x1xf32>
    %170 = vector.broadcast %169 : vector<32x1xf32> to vector<32x16xf32>
    %171 = arith.mulf %166, %170 : vector<32x16xf32>
    %172 = arith.truncf %171 : vector<32x16xf32> to vector<32x16xbf16>
    %173 = vector.extract_strided_slice %172 {offsets = [0, 0], sizes = [8, 16], strides = [1, 1]} : vector<32x16xbf16> to vector<8x16xbf16>
    %174 = vector.extract_strided_slice %144 {offsets = [0, 0], sizes = [16, 8], strides = [1, 1]} : vector<16x32xbf16> to vector<16x8xbf16>
    %cst_103 = arith.constant dense<0.000000e+00> : vector<8x8xf32>
    %175 = tpu.matmul %173, %174, %cst_103 {dimension_numbers = #tpu.dot_dimension_numbers<[1], [0], [0], [1], [0, 0, 1, 1], [], []>} : vector<8x16xbf16>, vector<16x8xbf16>, vector<8x8xf32> -> vector<8x8xf32>
    %176 = vector.extract_strided_slice %172 {offsets = [8, 0], sizes = [8, 16], strides = [1, 1]} : vector<32x16xbf16> to vector<8x16xbf16>
    %177 = vector.extract_strided_slice %144 {offsets = [0, 8], sizes = [16, 8], strides = [1, 1]} : vector<16x32xbf16> to vector<16x8xbf16>
    %cst_104 = arith.constant dense<0.000000e+00> : vector<8x8xf32>
    %178 = tpu.matmul %176, %177, %cst_104 {dimension_numbers = #tpu.dot_dimension_numbers<[1], [0], [0], [1], [0, 0, 1, 1], [], []>} : vector<8x16xbf16>, vector<16x8xbf16>, vector<8x8xf32> -> vector<8x8xf32>
    %179 = vector.extract_strided_slice %172 {offsets = [16, 0], sizes = [8, 16], strides = [1, 1]} : vector<32x16xbf16> to vector<8x16xbf16>
    %180 = vector.extract_strided_slice %144 {offsets = [0, 16], sizes = [16, 8], strides = [1, 1]} : vector<16x32xbf16> to vector<16x8xbf16>
    %cst_105 = arith.constant dense<0.000000e+00> : vector<8x8xf32>
    %181 = tpu.matmul %179, %180, %cst_105 {dimension_numbers = #tpu.dot_dimension_numbers<[1], [0], [0], [1], [0, 0, 1, 1], [], []>} : vector<8x16xbf16>, vector<16x8xbf16>, vector<8x8xf32> -> vector<8x8xf32>
    %182 = vector.extract_strided_slice %172 {offsets = [24, 0], sizes = [8, 16], strides = [1, 1]} : vector<32x16xbf16> to vector<8x16xbf16>
    %183 = vector.extract_strided_slice %144 {offsets = [0, 24], sizes = [16, 8], strides = [1, 1]} : vector<16x32xbf16> to vector<16x8xbf16>
    %cst_106 = arith.constant dense<0.000000e+00> : vector<8x8xf32>
    %184 = tpu.matmul %182, %183, %cst_106 {dimension_numbers = #tpu.dot_dimension_numbers<[1], [0], [0], [1], [0, 0, 1, 1], [], []>} : vector<8x16xbf16>, vector<16x8xbf16>, vector<8x8xf32> -> vector<8x8xf32>
    %185 = tpu.concatenate %175, %178, %181, %184 in 1 : vector<8x8xf32>, vector<8x8xf32>, vector<8x8xf32>, vector<8x8xf32> -> vector<8x32xf32>
    %186 = arith.truncf %185 : vector<8x32xf32> to vector<8x32xbf16>
    %cst_107 = arith.constant dense<0.000000e+00> : vector<8x32xf32>
    %187 = tpu.matmul %186, %140, %cst_107 {dimension_numbers = #tpu.dot_dimension_numbers<[1], [0], [0], [1], [0, 0, 1, 1], [], []>} : vector<8x32xbf16>, vector<32x32xbf16>, vector<8x32xf32> -> vector<8x32xf32>
    %188 = vector.broadcast %142 : vector<1x32xf32> to vector<8x32xf32>
    %189 = arith.addf %187, %188 : vector<8x32xf32>
    %190 = arith.addf %108, %189 : vector<8x32xf32>
    %c0_108 = arith.constant 0 : index
    %c2_109 = arith.constant 2 : index
    %c0_110 = arith.constant 0 : index
    %c0_111 = arith.constant 0 : index
    %191 = vector.load %arg11[%c0_108, %c2_109, %c0_110, %c0_111] : memref<1x6x1x32xf32, #tpu.memory_space<vmem>>, vector<1x1x1x32xf32>
    %192 = vector.shape_cast %191 : vector<1x1x1x32xf32> to vector<1x32xf32>
    %c0_112 = arith.constant 0 : index
    %c3_113 = arith.constant 3 : index
    %c0_114 = arith.constant 0 : index
    %c0_115 = arith.constant 0 : index
    %193 = vector.load %arg11[%c0_112, %c3_113, %c0_114, %c0_115] : memref<1x6x1x32xf32, #tpu.memory_space<vmem>>, vector<1x1x1x32xf32>
    %194 = vector.shape_cast %193 : vector<1x1x1x32xf32> to vector<1x32xf32>
    %cst_116 = arith.constant dense<0.000000e+00> : vector<8xf32>
    %195 = vector.multi_reduction <add>, %190, %cst_116 [1] : vector<8x32xf32> to vector<8xf32>
    %196 = vector.shape_cast %195 : vector<8xf32> to vector<8x1xf32>
    %cst_117 = arith.constant 3.200000e+01 : f32
    %197 = vector.broadcast %cst_117 : f32 to vector<8x1xf32>
    %198 = arith.divf %196, %197 : vector<8x1xf32>
    %199 = vector.broadcast %198 : vector<8x1xf32> to vector<8x32xf32>
    %200 = arith.subf %190, %199 : vector<8x32xf32>
    %201 = arith.mulf %200, %200 : vector<8x32xf32>
    %cst_118 = arith.constant dense<0.000000e+00> : vector<8xf32>
    %202 = vector.multi_reduction <add>, %201, %cst_118 [1] : vector<8x32xf32> to vector<8xf32>
    %203 = vector.shape_cast %202 : vector<8xf32> to vector<8x1xf32>
    %cst_119 = arith.constant 3.200000e+01 : f32
    %204 = vector.broadcast %cst_119 : f32 to vector<8x1xf32>
    %205 = arith.divf %203, %204 : vector<8x1xf32>
    %206 = vector.broadcast %198 : vector<8x1xf32> to vector<8x32xf32>
    %207 = arith.subf %190, %206 : vector<8x32xf32>
    %cst_120 = arith.constant 9.99999974E-6 : f32
    %208 = vector.broadcast %cst_120 : f32 to vector<8x1xf32>
    %209 = arith.addf %205, %208 : vector<8x1xf32>
    %210 = math.rsqrt %209 : vector<8x1xf32>
    %211 = vector.broadcast %210 : vector<8x1xf32> to vector<8x32xf32>
    %212 = arith.mulf %207, %211 : vector<8x32xf32>
    %213 = vector.broadcast %192 : vector<1x32xf32> to vector<8x32xf32>
    %214 = arith.mulf %212, %213 : vector<8x32xf32>
    %215 = vector.broadcast %194 : vector<1x32xf32> to vector<8x32xf32>
    %216 = arith.addf %214, %215 : vector<8x32xf32>
    %c0_121 = arith.constant 0 : index
    %c0_122 = arith.constant 0 : index
    %c0_123 = arith.constant 0 : index
    %217 = vector.load %arg7[%c0_121, %c0_122, %c0_123] : memref<1x32x64xbf16, #tpu.memory_space<vmem>>, vector<1x32x64xbf16>
    %218 = vector.shape_cast %217 : vector<1x32x64xbf16> to vector<32x64xbf16>
    %c0_124 = arith.constant 0 : index
    %c0_125 = arith.constant 0 : index
    %c0_126 = arith.constant 0 : index
    %219 = vector.load %arg8[%c0_124, %c0_125, %c0_126] : memref<1x1x64xf32, #tpu.memory_space<vmem>>, vector<1x1x64xf32>
    %220 = vector.shape_cast %219 : vector<1x1x64xf32> to vector<1x64xf32>
    %221 = arith.truncf %216 : vector<8x32xf32> to vector<8x32xbf16>
    %cst_127 = arith.constant dense<0.000000e+00> : vector<8x64xf32>
    %222 = tpu.matmul %221, %218, %cst_127 {dimension_numbers = #tpu.dot_dimension_numbers<[1], [0], [0], [1], [0, 0, 1, 1], [], []>} : vector<8x32xbf16>, vector<32x64xbf16>, vector<8x64xf32> -> vector<8x64xf32>
    %223 = vector.broadcast %220 : vector<1x64xf32> to vector<8x64xf32>
    %224 = arith.addf %222, %223 : vector<8x64xf32>
    %cst_128 = arith.constant 0.000000e+00 : f32
    %225 = vector.broadcast %cst_128 : f32 to vector<8x64xf32>
    %226 = arith.maximumf %224, %225 : vector<8x64xf32>
    %c0_129 = arith.constant 0 : index
    %c0_130 = arith.constant 0 : index
    %c0_131 = arith.constant 0 : index
    %227 = vector.load %arg9[%c0_129, %c0_130, %c0_131] : memref<1x64x32xbf16, #tpu.memory_space<vmem>>, vector<1x64x32xbf16>
    %228 = vector.shape_cast %227 : vector<1x64x32xbf16> to vector<64x32xbf16>
    %c0_132 = arith.constant 0 : index
    %c0_133 = arith.constant 0 : index
    %c0_134 = arith.constant 0 : index
    %229 = vector.load %arg10[%c0_132, %c0_133, %c0_134] : memref<1x1x32xf32, #tpu.memory_space<vmem>>, vector<1x1x32xf32>
    %230 = vector.shape_cast %229 : vector<1x1x32xf32> to vector<1x32xf32>
    %231 = arith.truncf %226 : vector<8x64xf32> to vector<8x64xbf16>
    %cst_135 = arith.constant dense<0.000000e+00> : vector<8x32xf32>
    %232 = tpu.matmul %231, %228, %cst_135 {dimension_numbers = #tpu.dot_dimension_numbers<[1], [0], [0], [1], [0, 0, 1, 1], [], []>} : vector<8x64xbf16>, vector<64x32xbf16>, vector<8x32xf32> -> vector<8x32xf32>
    %233 = vector.broadcast %230 : vector<1x32xf32> to vector<8x32xf32>
    %234 = arith.addf %232, %233 : vector<8x32xf32>
    %235 = arith.addf %216, %234 : vector<8x32xf32>
    %c0_136 = arith.constant 0 : index
    %c4_137 = arith.constant 4 : index
    %c0_138 = arith.constant 0 : index
    %c0_139 = arith.constant 0 : index
    %236 = vector.load %arg11[%c0_136, %c4_137, %c0_138, %c0_139] : memref<1x6x1x32xf32, #tpu.memory_space<vmem>>, vector<1x1x1x32xf32>
    %237 = vector.shape_cast %236 : vector<1x1x1x32xf32> to vector<1x32xf32>
    %c0_140 = arith.constant 0 : index
    %c5_141 = arith.constant 5 : index
    %c0_142 = arith.constant 0 : index
    %c0_143 = arith.constant 0 : index
    %238 = vector.load %arg11[%c0_140, %c5_141, %c0_142, %c0_143] : memref<1x6x1x32xf32, #tpu.memory_space<vmem>>, vector<1x1x1x32xf32>
    %239 = vector.shape_cast %238 : vector<1x1x1x32xf32> to vector<1x32xf32>
    %cst_144 = arith.constant dense<0.000000e+00> : vector<8xf32>
    %240 = vector.multi_reduction <add>, %235, %cst_144 [1] : vector<8x32xf32> to vector<8xf32>
    %241 = vector.shape_cast %240 : vector<8xf32> to vector<8x1xf32>
    %cst_145 = arith.constant 3.200000e+01 : f32
    %242 = vector.broadcast %cst_145 : f32 to vector<8x1xf32>
    %243 = arith.divf %241, %242 : vector<8x1xf32>
    %244 = vector.broadcast %243 : vector<8x1xf32> to vector<8x32xf32>
    %245 = arith.subf %235, %244 : vector<8x32xf32>
    %246 = arith.mulf %245, %245 : vector<8x32xf32>
    %cst_146 = arith.constant dense<0.000000e+00> : vector<8xf32>
    %247 = vector.multi_reduction <add>, %246, %cst_146 [1] : vector<8x32xf32> to vector<8xf32>
    %248 = vector.shape_cast %247 : vector<8xf32> to vector<8x1xf32>
    %cst_147 = arith.constant 3.200000e+01 : f32
    %249 = vector.broadcast %cst_147 : f32 to vector<8x1xf32>
    %250 = arith.divf %248, %249 : vector<8x1xf32>
    %251 = vector.broadcast %243 : vector<8x1xf32> to vector<8x32xf32>
    %252 = arith.subf %235, %251 : vector<8x32xf32>
    %cst_148 = arith.constant 9.99999974E-6 : f32
    %253 = vector.broadcast %cst_148 : f32 to vector<8x1xf32>
    %254 = arith.addf %250, %253 : vector<8x1xf32>
    %255 = math.rsqrt %254 : vector<8x1xf32>
    %256 = vector.broadcast %255 : vector<8x1xf32> to vector<8x32xf32>
    %257 = arith.mulf %252, %256 : vector<8x32xf32>
    %258 = vector.broadcast %237 : vector<1x32xf32> to vector<8x32xf32>
    %259 = arith.mulf %257, %258 : vector<8x32xf32>
    %260 = vector.broadcast %239 : vector<1x32xf32> to vector<8x32xf32>
    %261 = arith.addf %259, %260 : vector<8x32xf32>
    %c0_149 = arith.constant 0 : index
    %c0_150 = arith.constant 0 : index
    %c0_151 = arith.constant 0 : index
    %262 = vector.load %arg12[%c0_149, %c0_150, %c0_151] : memref<1x8x32xf32, #tpu.memory_space<vmem>>, vector<1x8x32xf32>
    %263 = vector.shape_cast %262 : vector<1x8x32xf32> to vector<8x32xf32>
    %264 = vector.shape_cast %261 : vector<8x32xf32> to vector<1x8x32xf32>
    tpu.vector_store %arg12[%c0_149, %c0_150, %c0_151], %264 {strides = array<i32>} : memref<1x8x32xf32, #tpu.memory_space<vmem>>, vector<1x8x32xf32>,
    return
  }
  func.func @transform_0(%arg0: i32, %arg1: i32) -> (i32, i32, i32) {
    %c0_i32 = arith.constant 0 : i32
    %c0_i32_0 = arith.constant 0 : i32
    %c0_i32_1 = arith.constant 0 : i32
    return %arg0, %c0_i32, %c0_i32_0 : i32, i32, i32
  }
  func.func @transform_1(%arg0: i32, %arg1: i32) -> (i32, i32, i32) {
    %c0_i32 = arith.constant 0 : i32
    %c0_i32_0 = arith.constant 0 : i32
    %c0_i32_1 = arith.constant 0 : i32
    return %arg0, %c0_i32, %c0_i32_0 : i32, i32, i32
  }
  func.func @transform_2(%arg0: i32, %arg1: i32) -> (i32, i32, i32) {
    %c0_i32 = arith.constant 0 : i32
    %c0_i32_0 = arith.constant 0 : i32
    %c0_i32_1 = arith.constant 0 : i32
    return %arg0, %c0_i32, %c0_i32_0 : i32, i32, i32
  }
  func.func @transform_3(%arg0: i32, %arg1: i32) -> (i32, i32, i32, i32) {
    %c0_i32 = arith.constant 0 : i32
    %c0_i32_0 = arith.constant 0 : i32
    %c0_i32_1 = arith.constant 0 : i32
    %c0_i32_2 = arith.constant 0 : i32
    return %arg1, %c0_i32, %c0_i32_0, %c0_i32_1 : i32, i32, i32, i32
  }
  func.func @transform_4(%arg0: i32, %arg1: i32) -> (i32, i32, i32, i32) {
    %c0_i32 = arith.constant 0 : i32
    %c0_i32_0 = arith.constant 0 : i32
    %c0_i32_1 = arith.constant 0 : i32
    %c0_i32_2 = arith.constant 0 : i32
    return %arg1, %c0_i32, %c0_i32_0, %c0_i32_1 : i32, i32, i32, i32
  }
  func.func @transform_5(%arg0: i32, %arg1: i32) -> (i32, i32, i32) {
    %c0_i32 = arith.constant 0 : i32
    %c0_i32_0 = arith.constant 0 : i32
    %c0_i32_1 = arith.constant 0 : i32
    return %arg1, %c0_i32, %c0_i32_0 : i32, i32, i32
  }
  func.func @transform_6(%arg0: i32, %arg1: i32) -> (i32, i32, i32) {
    %c0_i32 = arith.constant 0 : i32
    %c0_i32_0 = arith.constant 0 : i32
    %c0_i32_1 = arith.constant 0 : i32
    return %arg1, %c0_i32, %c0_i32_0 : i32, i32, i32
  }
  func.func @transform_7(%arg0: i32, %arg1: i32) -> (i32, i32, i32) {
    %c0_i32 = arith.constant 0 : i32
    %c0_i32_0 = arith.constant 0 : i32
    %c0_i32_1 = arith.constant 0 : i32
    return %arg1, %c0_i32, %c0_i32_0 : i32, i32, i32
  }
  func.func @transform_8(%arg0: i32, %arg1: i32) -> (i32, i32, i32) {
    %c0_i32 = arith.constant 0 : i32
    %c0_i32_0 = arith.constant 0 : i32
    %c0_i32_1 = arith.constant 0 : i32
    return %arg1, %c0_i32, %c0_i32_0 : i32, i32, i32
  }
  func.func @transform_9(%arg0: i32, %arg1: i32) -> (i32, i32, i32, i32) {
    %c0_i32 = arith.constant 0 : i32
    %c0_i32_0 = arith.constant 0 : i32
    %c0_i32_1 = arith.constant 0 : i32
    %c0_i32_2 = arith.constant 0 : i32
    return %arg1, %c0_i32, %c0_i32_0, %c0_i32_1 : i32, i32, i32, i32
  }
  func.func @transform_10(%arg0: i32, %arg1: i32) -> (i32, i32, i32) {
    %c0_i32 = arith.constant 0 : i32
    %c0_i32_0 = arith.constant 0 : i32
    %c0_i32_1 = arith.constant 0 : i32
    return %arg0, %c0_i32, %c0_i32_0 : i32, i32, i32
  }
}

</mosaic_0001>

<bundles_post_ra>
// kernel: decoder_forward.3
= control target key start
LH: loop header
LB: loop body
LE: loop exit
PB: predicated region body
PF: predicated region fallthrough
CT: control target
= control target key end

     0   :  { %v111_v0 = vmov 0.0   ;;  %vm112_vm0 = vmmov 0   ;;  %vm41_vm1 = vcmask 261120   ;;  %s154_s1 = inlined_call_operand.vmem [shape: bf16[32,128], index: 1, kind: input, shape index: {}]   ;;  %s155_s0 = inlined_call_operand.vmem [shape: f32[16,32], index: 0, kind: input, shape index: {}]   ;;  %s156_s2 = inlined_call_operand.vmem [shape: f32[1,128], index: 2, kind: input, shape index: {}]   ;;  %s157_s3 = inlined_call_operand.vmem [shape: f32[16,128], index: 3, kind: output, shape index: {}]  }
   0x1   :  { %99 = vmatprep.subr.bf16.mxu0 %v111_v0  ;;  %v109_v1 = vld [vmem:[%s154_s1 + $0x8] sm:$0xff]   ;;  %103 = vmatprep.mubr.msk.bf16.mxu0 %vm112_vm0, %v111_v0  ;;  %v110_v2 = vld [vmem:[%s154_s1] sm:$0xff]  }
   0x2   :  { %100 = vmatpush3.bf16.msra.mxu0 %v109_v1  ;;  %v15_v3 = vld [vmem:[%s155_s0] sm:$0xff]  ;;  %v16_v4 = vld [vmem:[%s155_s0 + $0x8] sm:$0xff] }
   0x3   :  { %101 = vmatprep.subr.bf16.mxu0 %v111_v0  ;;  %v17_v5 = vpack.c.bf16 %v16_v4, %v15_v3  ;;  %v92_v6 = vld [vmem:[%s156_s2] ss:$0 sm:$0xff] }
   0x6   :  { %102 = vmatpush3.bf16.msra.mxu0 %v110_v2 }
   0x9   :  { %104 = vmatmul.mubr.msk.bf16.vlgmr.msra.gmra.mxu0 %vm41_vm1, %v17_v5 }
  0xc9   :  { %v79_v7 = vpop.f32.mrf.mxu0 }
  0xca   :  { %v80_v8 = vadd.f32 %v92_v6, %v79_v7 }
  0xcb   :  { %v105_v9 = vpop.f32.mrf.mxu0 }
  0xcc   :  { %86 = vst [vmem:[%s157_s3] sm:$0xff] %v80_v8 }
  0xcd   :  { %v82_v10 = vpop.f32.mrf.mxu0 }
  0xce   :  { %v83_v11 = vadd.f32 %v92_v6, %v82_v10 }
  0xcf   :  { %v106_v12 = vpop.f32.mrf.mxu0 }
  0xd0   :  { %87 = vst [vmem:[%s157_s3 + $0x8] sm:$0xff] %v83_v11 }

// kernel: decoder_forward.2
= control target key start
LH: loop header
LB: loop body
LE: loop exit
PB: predicated region body
PF: predicated region fallthrough
CT: control target
= control target key end

     0   :  { %s2999_s13 = smov 0   ;;  %s3001_s14 = smov 0   ;;  %s3362_s0 = inlined_call_operand.vmem [shape: f32[2,8,32], index: 0, kind: input, shape index: {}]   ;;  %s3363_s1 = inlined_call_operand.vmem [shape: f32[2,16,32], index: 1, kind: input, shape index: {}]   ;;  %s3364_s2 = inlined_call_operand.vmem [shape: f32[2,16,32], index: 2, kind: input, shape index: {}]   ;;  %s3365_s3 = inlined_call_operand.vmem [shape: bf16[2,8,32,32], index: 3, kind: input, shape index: {}]   ;;  %s3366_s4 = inlined_call_operand.vmem [shape: f32[2,8,1,32], index: 4, kind: input, shape index: {}]   ;;  %s3367_s5 = inlined_call_operand.vmem [shape: bf16[2,32,64], index: 5, kind: input, shape index: {}]   ;;  %s3368_s6 = inlined_call_operand.vmem [shape: f32[2,1,64], index: 6, kind: input, shape index: {}]   ;;  %s3369_s7 = inlined_call_operand.vmem [shape: bf16[2,64,32], index: 7, kind: input, shape index: {}]   ;;  %s3370_s8 = inlined_call_operand.vmem [shape: f32[2,1,32], index: 8, kind: input, shape index: {}]   ;;  %s3371_s9 = inlined_call_operand.vmem [shape: f32[2,6,1,32], index: 9, kind: input, shape index: {}]   ;;  %s3372_s10 = inlined_call_operand.vmem [shape: f32[2,8,32], index: 10, kind: output, shape index: {}]  }
   0x1   :  { %3376 = sst [smem:[#allocation7_spill]] %s3362_s0  ;;  %s3003_s15 = smov 0  }
   0x2   :  { %3377 = sst [smem:[#allocation8_spill]] %s3363_s1  ;;  %s3005_s16 = smov 0  }
   0x3   :  { %3378 = sst [smem:[#allocation9_spill]] %s3364_s2  ;;  %s3007_s17 = smov 0  }
   0x4   :  { %3379 = sst [smem:[#allocation10_spill]] %s3365_s3 }
   0x5   :  { %3380 = sst [smem:[#allocation11_spill]] %s3366_s4 }
   0x6 LB: > { %3381 = sst [smem:[#allocation2_spill]] %s2926_s15  ;;  %s29_s18 = sadd.s32 1, %s2926_s15  ;;  %s2934_s17 = sphi %s3007_s17, %s20_s17   ;;  %s2930_s16 = sphi %s3005_s16, %s3395_s16   ;;  %s2926_s15 = sphi %s3003_s15, %s3394_s15   ;;  %s2922_s14 = sphi %s3001_s14, %s3393_s14   ;;  %s2918_s13 = sphi %s2999_s13, %s3392_s13  }
   0x7   : > { %3382 = sst [smem:[#allocation3_spill]] %s2930_s16  ;;  %s32_s19 = sadd.s32 1, %s2930_s16 }
   0x8   : > { %3383 = sst [smem:[#allocation4_spill]] %s2934_s17  ;;  %p30_p0 = scmp.ge.s32.totalorder %s29_s18, 2 }
   0x9   : > { %p2417_p1 = scmp.ge.s32.totalorder %s2934_s17, 1  ;;  %p407_p2 = scmp.lt.s32.totalorder %s2934_s17, 5 }
   0xa   : > { %s3397_s18 = smov (%p30_p0, %s29_s18), 0  ;;  %s3399_s19 = smov (!%p30_p0, %s32_s19), %s2930_s16 }
   0xb   : > { %3384 = sst [smem:[#allocation5_spill]] %s3397_s18  ;;  %p408_p3 = pnand %p2417_p1, %p407_p2 }
   0xc   : > { %p34_p4 = scmp.ge.s32.totalorder %s3399_s19, 2  ;;  %p482_p5 = scmp.lt.s32.totalorder (!%p408_p3), %s2922_s14, 1 }
   0xd   : > { %411 = sbr.rel (%p408_p3) target bundleno = 4059 (0xfdb), region = 60  ;;  %p496_p6 = scmp.lt.s32.totalorder (!%p408_p3), %s2918_s13, 1 }
   0xe   : > { %s3401_s19 = smov (%p34_p4, %s3399_s19), 0  ;;  %s3386_s0 = sld [smem:[#allocation7_spill]] (!%p408_p3) }
   0xf   : > { %3385 = sst [smem:[#allocation6_spill]] %s3401_s19  ;;  %p2431_p7 = scmp.ne.s32.totalorder (!%p408_p3), %s2918_s13, 0 }
  0x10   : > { %s3387_s1 = sld [smem:[#allocation8_spill]] (!%p408_p3) }
  0x11   : > { %s3388_s2 = sld [smem:[#allocation9_spill]] (!%p408_p3) }
  0x12   : > { %s3403_s14 = smov (!%p482_p5, %s2922_s14), 1  ;;  %s3389_s3 = sld [smem:[#allocation10_spill]] }
  0x13   : > { %s3033_s20 = scalar_select %p496_p6, %s2918_s13, 1 }
  0x14   : > { %s2418_s21 = sshll.u32 %s3403_s14, 3  ;;  %s2538_s22 = sshll.u32 %s3403_s14, 4 }
  0x15   : > { %s485_s25 = scalar_lea.vmem %s3386_s0, %s2418_s21  ;;  %s2540_s12 = sshll.u32 %s3033_s20, 7 }
  0x16   : > { %s3041_s28 = scalar_lea.vmem %s3387_s1, %s2538_s22  ;;  %s2425_s14 = sshll.u32 %s3033_s20, 3 }
  0x17   : > { %s3046_s11 = scalar_lea.vmem %s3388_s2, %s2538_s22  ;;  %s3390_s4 = sld [smem:[#allocation11_spill]] }
  0x18   : > { %s3052_s16 = scalar_lea.vmem %s3389_s3, %s2540_s12  ;;  %s2541_s26 = sshll.u32 %s3033_s20, 4 }
  0x19   : > { %s3064_s1 = scalar_lea.vmem %s3367_s5, %s2541_s26  ;;  %s512_s30 = scalar_lea.vmem %s3368_s6, %s3033_s20 }
  0x1a   : > { %s2542_s2 = sshll.u32 %s3033_s20, 5  ;;  %s520_s12 = scalar_lea.vmem %s3370_s8, %s3033_s20 }
  0x1b   : > { %s3078_s15 = scalar_lea.vmem %s3369_s7, %s2542_s2  ;;  %s3084_s0 = scalar_lea.vmem %s3372_s10, %s2418_s21 }
  0x1c   : > { %533 = sbr.rel (%p2431_p7) target bundleno = 35 (0x23), region = 64 }
  0x1d   : > { %s3058_s24 = scalar_lea.vmem %s3390_s4, %s2425_s14  ;;  %s2787_s14 = smul.u32 6, %s3033_s20 }
  0x1f   : > { %s3089_s22 = scalar_lea.vmem %s3371_s9, %s2787_s14 }
  0x21   : > { %v534_v0 = vld [vmem:[%s485_s25] sm:$0xff]  ;;  %vm535_vm0 = vcmask 261120  }
  0x22   : > { %536 = vst.msk [vmem:[%s3084_s0] sm:$0xff] %vm535_vm0, %v534_v0 }
  0x23 PF: > { %v2836_v1 = vld [vmem:[%s3052_s16 + $0x8] sm:$0xff]   ;;  %v2936_v2 = vmov 0.0   ;;  %v2837_v3 = vld [vmem:[%s3052_s16 + $0x18] sm:$0xff]   ;;  %v2838_v4 = vld [vmem:[%s3052_s16] sm:$0xff]   ;;  %vm2937_vm1 = vmmov 0   ;;  %vm562_vm2 = vcmask 261120  }
  0x24   : > { %2607 = vmatprep.subr.bf16.mxu0 %v2936_v2  ;;  %2615 = vmatprep.subr.bf16.mxu1 %v2936_v2  ;;  %v2839_v5 = vld [vmem:[%s3052_s16 + $0x10] sm:$0xff]   ;;  %v2840_v8 = vld [vmem:[%s3052_s16 + $0x28] sm:$0xff]   ;;  %v2841_v9 = vld [vmem:[%s3052_s16 + $0x20] sm:$0xff]   ;;  %vm747_vm3 = vcmask 64512   ;;  %s2938_s2 = smov 112   ;;  %s2939_s3 = smov 120  }
  0x25   : > { %2608 = vmatpush3.bf16.msra.mxu0 %v2836_v1  ;;  %2611 = vmatprep.mubr.msk.bf16.mxu0 %vm2937_vm1, %v2936_v2  ;;  %v2432_v10 = vld [vmem:[%s3058_s24] ss:$0 sm:$0xff]  ;;  %v2441_v11 = vld [vmem:[%s3058_s24 + $0x1] ss:$0 sm:$0xff]  ;;  %s2940_s4 = smov 104   ;;  %vm995_vm4 = vcmask 1043456  }
  0x26   : > { %2616 = vmatpush3.bf16.msra.mxu1 %v2837_v3  ;;  %2609 = vmatprep.subr.bf16.mxu0 %v2936_v2  ;;  %v2450_v30 = vld [vmem:[%s3058_s24 + $0x2] ss:$0 sm:$0xff]  ;;  %s2941_s13 = smov 8   ;;  %s2942_s17 = smov 16   ;;  %vm1201_vm5 = vcmask 130048   ;;  %vm1203_vm6 = vcmask 195584  }
  0x27   : > { %2617 = vmatprep.subr.bf16.mxu1 %v2936_v2  ;;  %2619 = vmatprep.mubr.msk.bf16.mxu1 %vm2937_vm1, %v2936_v2  ;;  %s2943_s21 = smov 24   ;;  %vm2170_vm7 = vcmask 523264  }
  0x29   : > { %v3106_v6 = vld [vmem:[%s3084_s0] sm:$0xff]  ;;  %2610 = vmatpush3.bf16.msra.mxu0 %v2838_v4 }
  0x2a   : > { %v543_v7 = vpack.c.bf16 %v3106_v6, %v3106_v6  ;;  %2618 = vmatpush3.bf16.msra.mxu1 %v2839_v5  ;;  %2623 = vmatprep.subr.bf16.mxu0 %v2936_v2 }
  0x2b   : > { %2631 = vmatprep.subr.bf16.mxu1 %v2936_v2 }
  0x2c   : > { %2612 = vmatmul.mubr.msk.bf16.vlgmr.msra.gmra.mxu0 %vm562_vm2, %v543_v7 }
  0x2d   : > { %2620 = vmatmul.mubr.msk.bf16.vlgmr.msra.gmra.mxu1 %vm562_vm2, %v543_v7  ;;  %2627 = vmatprep.mubr.msk.bf16.mxu0 %vm2937_vm1, %v2936_v2 }
  0x2e   : > { %2633 = vmatprep.mubr.msk.bf16.mxu1 %vm2937_vm1, %v2936_v2  ;;  %2624 = vmatpush3.bf16.msra.mxu0 %v2840_v8 }
  0x2f   : > { %2625 = vmatprep.subr.bf16.mxu0 %v2936_v2 }
  0x32   : > { %2626 = vmatpush3.bf16.msra.mxu0 %v2841_v9 }
  0x33   : > { %2637 = vmatprep.subr.bf16.mxu0 %v2936_v2 }
  0x35   : > { %2628 = vmatmul.mubr.msk.bf16.vlgmr.msra.gmra.mxu0 %vm562_vm2, %v543_v7 }
  0x36   : > { %2639 = vmatprep.mubr.msk.bf16.mxu0 %vm2937_vm1, %v2936_v2 }
  0xec   : > { %v600_v12 = vpop.f32.mrf.mxu0 }
  0xed   : > { %v601_v13 = vadd.f32 %v2432_v10, %v600_v12  ;;  %v666_v14 = vpop.f32.mrf.mxu1 }
  0xee   : > { %v667_v15 = vadd.f32 %v2441_v11, %v666_v14  ;;  %v2613_v16 = vpop.f32.mrf.mxu0 }
  0xef   : > { %v606_v17 = vmul.f32 0.35355338, %v601_v13  ;;  %v2621_v18 = vpop.f32.mrf.mxu1 }
  0xf0   : > { %v744_v19 = vpack.c.bf16 %v667_v15, %v667_v15  ;;  %v603_v20 = vpop.f32.mrf.mxu0 }
  0xf1   : > { %v669_v21 = vpop.f32.mrf.mxu1  ;;  %v746_v22 = vpack.c.bf16 %v606_v17, %v606_v17 }
  0xf2   : > { %848 = vrot.lane.b32.xlu1 %v744_v19, %s2938_s2  ;;  %798 = vrot.lane.b32.xlu0 %v744_v19, %s2939_s3  ;;  %v2614_v23 = vpop.f32.mrf.mxu0  ;;  %v752_v24 = vsel %vm747_vm3, %v744_v19, 0 }
  0xf3   : > { %v2622_v25 = vpop.f32.mrf.mxu1  ;;  %2632 = vmatpush3.bf16.xpose.msra.mxu1 %v752_v24 }
  0xf4   : > { %2643 = vmatprep.subr.bf16.mxu1 %v2936_v2 }
  0xf5   : > { %v731_v26 = vpop.f32.mrf.mxu0 }
  0xf6   : > { %898 = vrot.lane.b32.xlu1 %v744_v19, %s2940_s4  ;;  %795 = vrot.lane.b32.xlu0 %v746_v22, %s2939_s3  ;;  %v732_v33 = vadd.f32 %v2450_v30, %v731_v26 }
  0xf7   : > { %v2629_v27 = vpop.f32.mrf.mxu0 }
  0xf8   : > { %v3143_v37 = vpack.c.bf16 %v732_v33, %v732_v33 }
  0xf9   : > { %v734_v28 = vpop.f32.mrf.mxu0 }
  0xfa   : > { %896 = vrot.lane.b32.xlu1 %v746_v22, %s2940_s4  ;;  %846 = vrot.lane.b32.xlu0 %v746_v22, %s2938_s2  ;;  %v997_v40 = vsel %vm995_vm4, %v3143_v37, 0 }
  0xfb   : > { %2634 = vmatmul.mubr.msk.bf16.vlgmr.msra.gmra.mxu1 %vm747_vm3, %v746_v22  ;;  %v2630_v29 = vpop.f32.mrf.mxu0 }
  0xfc   : > { %2645 = vmatprep.mubr.msk.bf16.mxu1 %vm2937_vm1, %v2936_v2 }
 0x164   : > { %v849_v31 = vpop.permute.xlu1 %848  ;;  %v799_v32 = vpop.permute.xlu0 %798 }
 0x165   : > { %v854_v34 = vsel %vm747_vm3, %v849_v31, 0  ;;  %v804_v35 = vsel %vm747_vm3, %v799_v32, 0 }
 0x166   : > { %2638 = vmatpush3.bf16.xpose.msra.mxu0 %v804_v35  ;;  %2644 = vmatpush3.bf16.xpose.msra.mxu1 %v854_v34 }
 0x167   : > { %2649 = vmatprep.subr.bf16.mxu0 %v2936_v2  ;;  %2655 = vmatprep.subr.bf16.mxu1 %v2936_v2 }
 0x168   : > { %v796_v36 = vpop.permute.xlu0 %795  ;;  %v899_v38 = vpop.permute.xlu1 %898 }
 0x169   : > { %v904_v41 = vsel %vm747_vm3, %v899_v38, 0 }
 0x16c   : > { %v847_v39 = vpop.permute.xlu0 %846  ;;  %v897_v42 = vpop.permute.xlu1 %896 }
 0x16d   : > { %2640 = vmatmul.mubr.msk.bf16.vlgmr.msra.gmra.mxu0 %vm747_vm3, %v796_v36  ;;  %2646 = vmatmul.mubr.msk.bf16.vlgmr.msra.gmra.mxu1 %vm747_vm3, %v847_v39 }
 0x16e   : > { %2650 = vmatpush3.bf16.xpose.msra.mxu0 %v904_v41  ;;  %2651 = vmatprep.mubr.msk.bf16.mxu0 %vm2937_vm1, %v2936_v2 }
 0x16f   : > { %2656 = vmatpush3.bf16.msra.mxu1 %v997_v40  ;;  %2661 = vmatprep.subr.bf16.mxu0 %v2936_v2 }
 0x170   : > { %2657 = vmatprep.mubr.msk.bf16.mxu1 %vm2937_vm1, %v2936_v2  ;;  %2667 = vmatprep.subr.bf16.mxu1 %v2936_v2 }
 0x175   : > { %2652 = vmatmul.mubr.msk.bf16.vlgmr.msra.gmra.mxu0 %vm747_vm3, %v897_v42 }
 0x176   : > { %2663 = vmatprep.mubr.msk.bf16.mxu0 %vm2937_vm1, %v2936_v2 }
 0x1bb   : > { %v788_v43 = vpop.f32.mrf.mxu1 }
 0x1bc   : > { %v946_v44 = vsel %vm747_vm3, %v788_v43, -inf }
 0x1bd   : > { %947 = vmax.xlane.f32.xlu0 %v946_v44  ;;  %v2635_v45 = vpop.f32.mrf.mxu1  ;;  %v2843_v44 = vld [vmem:[%s3052_s16 + $0x30] sm:$0xff]  }
 0x1bf   : > { %v791_v46 = vpop.f32.mrf.mxu1 }
 0x1c1   : > { %v2636_v47 = vpop.f32.mrf.mxu1 }
 0x22d   : > { %v840_v48 = vpop.f32.mrf.mxu0  ;;  %v890_v49 = vpop.f32.mrf.mxu1 }
 0x22e   : > { %v952_v50 = vsel %vm747_vm3, %v890_v49, -inf  ;;  %v949_v51 = vsel %vm747_vm3, %v840_v48, -inf }
 0x22f   : > { %953 = vmax.xlane.f32.xlu0 %v952_v50  ;;  %v2647_v52 = vpop.f32.mrf.mxu1  ;;  %950 = vmax.xlane.f32.xlu1 %v949_v51  ;;  %v2641_v53 = vpop.f32.mrf.mxu0 }
 0x231   : > { %v843_v54 = vpop.f32.mrf.mxu0  ;;  %v893_v55 = vpop.f32.mrf.mxu1 }
 0x233   : > { %v2642_v56 = vpop.f32.mrf.mxu0  ;;  %v2648_v57 = vpop.f32.mrf.mxu1 }
 0x235   : > { %v940_v58 = vpop.f32.mrf.mxu0 }
 0x236   : > { %v955_v59 = vsel %vm747_vm3, %v940_v58, -inf }
 0x237   : > { %956 = vmax.xlane.f32.xlu0 %v955_v59  ;;  %v2653_v60 = vpop.f32.mrf.mxu0 }
 0x239   : > { %v943_v61 = vpop.f32.mrf.mxu0 }
 0x23b   : > { %v2654_v62 = vpop.f32.mrf.mxu0 }
 0x240   : > { %1042 = vrot.lane.b32.xlu1 %v3143_v37, %s2939_s3 }
 0x246   : > { %v948_v63 = vpop.xlane.xlu0 %947 }
 0x247   : > { %v958_v0 = vsub.f32 %v788_v43, %v948_v63  ;;  %v2842_v43 = vld [vmem:[%s3052_s16 + $0x38] sm:$0xff]  }
 0x249   : > { %v962_v1 = vmul.f32 1.442695, %v958_v0 }
 0x24b   : > { %2858 = vpow2.f32 %v962_v1 }
 0x258   : > { %v2859_v3 = vpop.eup %2858 }
 0x259   : > { %v970_v4 = vsel %vm747_vm3, %v2859_v3, 0.0 }
 0x264   : > { %971 = vadd.xlane.f32.xlu1 %v970_v4 }
 0x2b8   : > { %v954_v5 = vpop.xlane.xlu0 %953  ;;  %v951_v7 = vpop.xlane.xlu1 %950 }
 0x2b9   : > { %v960_v8 = vsub.f32 %v890_v49, %v954_v5  ;;  %v959_v9 = vsub.f32 %v840_v48, %v951_v7  ;;  %v2467_v5 = vld [vmem:[%s3058_s24 + $0x3] ss:$0 sm:$0xff] }
 0x2bb   : > { %v966_v10 = vmul.f32 1.442695, %v960_v8  ;;  %v964_v11 = vmul.f32 1.442695, %v959_v9 }
 0x2bc   : > { %v1043_v12 = vpop.permute.xlu1 %1042 }
 0x2bd   : > { %2860 = vpow2.f32 %v966_v10  ;;  %v1048_v13 = vsel %vm995_vm4, %v1043_v12, 0 }
 0x2be   : > { %2862 = vpow2.f32 %v964_v11  ;;  %2662 = vmatpush3.bf16.msra.mxu0 %v1048_v13 }
 0x2bf   : > { %2673 = vmatprep.subr.bf16.mxu0 %v2936_v2 }
 0x2c0   : > { %v957_v14 = vpop.xlane.xlu0 %956 }
 0x2c1   : > { %v961_v15 = vsub.f32 %v940_v58, %v957_v14 }
 0x2c3   : > { %v968_v16 = vmul.f32 1.442695, %v961_v15 }
 0x2c5   : > { %2864 = vpow2.f32 %v968_v16 }
 0x2ca   : > { %v2861_v17 = vpop.eup %2860 }
 0x2cb   : > { %v2863_v18 = vpop.eup %2862  ;;  %v976_v19 = vsel %vm747_vm3, %v2861_v17, 0.0 }
 0x2cc   : > { %977 = vadd.xlane.f32.xlu1 %v976_v19  ;;  %v973_v20 = vsel %vm747_vm3, %v2863_v18, 0.0  ;;  %v2844_v19 = vld [vmem:[%s3052_s16 + $0x58] sm:$0xff]  }
 0x2cd   : > { %974 = vadd.xlane.f32.xlu0 %v973_v20  ;;  %v1299_v20 = vld [vmem:[%s3041_s28] sm:$0xff] }
 0x2d2   : > { %v2865_v21 = vpop.eup %2864 }
 0x2d3   : > { %v979_v22 = vsel %vm747_vm3, %v2865_v21, 0.0 }
 0x2d4   : > { %980 = vadd.xlane.f32.xlu0 %v979_v22 }
 0x2dd   : > { %1140 = vrot.lane.b32.xlu1 %v3143_v37, %s2940_s4 }
 0x2ea   : > { %1090 = vrot.lane.b32.xlu0 %v3143_v37, %s2938_s2 }
 0x2ed   : > { %v972_v23 = vpop.xlane.xlu1 %971 }
 0x2ee   : > { %2866 = vrcp.f32 %v972_v23  ;;  %v2846_v23 = vld [vmem:[%s3052_s16 + $0x48] sm:$0xff]  }
 0x2fb   : > { %v2867_v27 = vpop.eup %2866 }
 0x2fc   : > { %v986_v29 = vmul.f32 %v2867_v27, %v2859_v3 }
 0x355   : > { %v978_v25 = vpop.xlane.xlu1 %977 }
 0x356   : > { %v975_v24 = vpop.xlane.xlu0 %974 }
 0x357   : > { %2868 = vrcp.f32 %v975_v24  ;;  %v2847_v24 = vld [vmem:[%s3052_s16 + $0x40] sm:$0xff]  }
 0x358   : > { %2870 = vrcp.f32 %v978_v25 }
 0x359   : > { %v1141_v33 = vpop.permute.xlu1 %1140 }
 0x35a   : > { %v1146_v38 = vsel %vm995_vm4, %v1141_v33, 0 }
 0x35d   : > { %v981_v26 = vpop.xlane.xlu0 %980 }
 0x35e   : > { %2872 = vrcp.f32 %v981_v26 }
 0x361   : > { %v1091_v31 = vpop.permute.xlu0 %1090 }
 0x362   : > { %v1096_v35 = vsel %vm995_vm4, %v1091_v31, 0  ;;  %v2473_v31 = vld [vmem:[%s3089_s22 + $0x1] ss:$0 sm:$0xff] }
 0x364   : > { %v2869_v28 = vpop.eup %2868 }
 0x365   : > { %v987_v30 = vmul.f32 %v2869_v28, %v2863_v18  ;;  %v2871_v34 = vpop.eup %2870 }
 0x366   : > { %v988_v39 = vmul.f32 %v2871_v34, %v2861_v17 }
 0x367   : > { %v990_v32 = vpack.c.bf16 %v987_v30, %v986_v29  ;;  %v2472_v29 = vld [vmem:[%s3089_s22] ss:$0 sm:$0xff] }
 0x369   : > { %2658 = vmatmul.mubr.msk.bf16.vlgmr.msra.gmra.mxu1 %vm747_vm3, %v990_v32  ;;  %v1040_v36 = vrot.slane %v990_v32, 4 }
 0x36a   : > { %2668 = vmatpush3.bf16.msra.mxu1 %v1096_v35  ;;  %2669 = vmatprep.mubr.msk.bf16.mxu1 %vm2937_vm1, %v2936_v2  ;;  %v2488_v35 = vld [vmem:[%s3058_s24 + $0x5] ss:$0 sm:$0xff] }
 0x36b   : > { %v2873_v37 = vpop.eup %2872  ;;  %2664 = vmatmul.mubr.msk.bf16.vlgmr.msra.gmra.mxu0 %vm747_vm3, %v1040_v36  ;;  %2679 = vmatprep.subr.bf16.mxu1 %v2936_v2 }
 0x36c   : > { %2674 = vmatpush3.bf16.msra.mxu0 %v1146_v38  ;;  %v989_v40 = vmul.f32 %v2873_v37, %v2865_v21  ;;  %2675 = vmatprep.mubr.msk.bf16.mxu0 %vm2937_vm1, %v2936_v2  ;;  %v1300_v21 = vld [vmem:[%s3041_s28 + $0x8] sm:$0xff] }
 0x36d   : > { %2687 = vmatprep.subr.bf16.mxu0 %v2936_v2  ;;  %v1380_v22 = vpack.c.bf16 %v1300_v21, %v1299_v20 }
 0x36e   : > { %v991_v41 = vpack.c.bf16 %v989_v40, %v988_v39 }
 0x370   : > { %v1139_v42 = vrot.slane %v991_v41, 4 }
 0x371   : > { %2670 = vmatmul.mubr.msk.bf16.vlgmr.msra.gmra.mxu1 %vm747_vm3, %v991_v41 }
 0x372   : > { %2683 = vmatprep.mubr.msk.bf16.mxu1 %vm2937_vm1, %v2936_v2  ;;  %2680 = vmatpush3.bf16.msra.mxu1 %v2842_v43 }
 0x373   : > { %2676 = vmatmul.mubr.msk.bf16.vlgmr.msra.gmra.mxu0 %vm747_vm3, %v1139_v42  ;;  %2681 = vmatprep.subr.bf16.mxu1 %v2936_v2 }
 0x374   : > { %2691 = vmatprep.mubr.msk.bf16.mxu0 %vm2937_vm1, %v2936_v2  ;;  %2688 = vmatpush3.bf16.msra.mxu0 %v2846_v23 }
 0x375   : > { %2689 = vmatprep.subr.bf16.mxu0 %v2936_v2 }
 0x376   : > { %2682 = vmatpush3.bf16.msra.mxu1 %v2843_v44  ;;  %v2848_v44 = vld [vmem:[%s3052_s16 + $0x68] sm:$0xff]  }
 0x377   : > { %2695 = vmatprep.subr.bf16.mxu1 %v2936_v2 }
 0x378   : > { %2690 = vmatpush3.bf16.msra.mxu0 %v2847_v24 }
 0x379   : > { %2703 = vmatprep.subr.bf16.mxu0 %v2936_v2 }
 0x429   : > { %v1033_v45 = vpop.f32.mrf.mxu1 }
 0x42b   : > { %v2659_v46 = vpop.f32.mrf.mxu1  ;;  %v1084_v47 = vpop.f32.mrf.mxu0 }
 0x42c   : > { %1189 = vrot.lane.b32.xlu1 %v1084_v47, %s2941_s13  ;;  %v1301_v46 = vld [vmem:[%s3046_s11] sm:$0xff]  ;;  %v1302_v47 = vld [vmem:[%s3046_s11 + $0x8] sm:$0xff] }
 0x42d   : > { %v1036_v48 = vpop.f32.mrf.mxu1  ;;  %v2665_v49 = vpop.f32.mrf.mxu0 }
 0x42e   : > { %v1450_v48 = vpack.c.bf16 %v1302_v47, %v1301_v46 }
 0x42f   : > { %v2660_v50 = vpop.f32.mrf.mxu1  ;;  %v1087_v51 = vpop.f32.mrf.mxu0 }
 0x430   : > { %v2479_v51 = vld [vmem:[%s3058_s24 + $0x4] ss:$0 sm:$0xff] }
 0x431   : > { %v2666_v52 = vpop.f32.mrf.mxu0  ;;  %v1132_v53 = vpop.f32.mrf.mxu1 }
 0x432   : > { %1193 = vrot.lane.b32.xlu0 %v1132_v53, %s2942_s17 }
 0x433   : > { %v2671_v54 = vpop.f32.mrf.mxu1  ;;  %v1182_v55 = vpop.f32.mrf.mxu0 }
 0x434   : > { %1197 = vrot.lane.b32.xlu1 %v1182_v55, %s2943_s21 }
 0x435   : > { %v1135_v56 = vpop.f32.mrf.mxu1  ;;  %v2677_v57 = vpop.f32.mrf.mxu0 }
 0x437   : > { %v2672_v58 = vpop.f32.mrf.mxu1  ;;  %v1185_v59 = vpop.f32.mrf.mxu0 }
 0x439   : > { %v2678_v60 = vpop.f32.mrf.mxu0 }
 0x49e   : > { %v1190_v61 = vpop.permute.xlu1 %1189 }
 0x49f   : > { %v1200_v62 = vsel %vm747_vm3, %v1033_v45, %v1190_v61  ;;  %v2849_v45 = vld [vmem:[%s3052_s16 + $0x60] sm:$0xff]  }
 0x4a4   : > { %v1194_v63 = vpop.permute.xlu0 %1193 }
 0x4a5   : > { %v1202_v0 = vsel %vm1201_vm5, %v1200_v62, %v1194_v63 }
 0x4a6   : > { %v1198_v1 = vpop.permute.xlu1 %1197 }
 0x4a7   : > { %v1204_v3 = vsel %vm1203_vm6, %v1202_v0, %v1198_v1  ;;  %v2497_v1 = vld [vmem:[%s3058_s24 + $0x6] ss:$0 sm:$0xff] }
 0x4a8   : > { %v1205_v4 = vpack.c.bf16 %v1204_v3, %v1204_v3 }
 0x4aa   : > { %2684 = vmatmul.mubr.msk.bf16.vlgmr.msra.gmra.mxu1 %vm562_vm2, %v1205_v4 }
 0x4ab   : > { %2699 = vmatprep.mubr.msk.bf16.mxu1 %vm2937_vm1, %v2936_v2  ;;  %2696 = vmatpush3.bf16.msra.mxu1 %v2844_v19 }
 0x4ac   : > { %2697 = vmatprep.subr.bf16.mxu1 %v2936_v2 }
 0x56a   : > { %v1261_v7 = vpop.f32.mrf.mxu1 }
 0x56b   : > { %v1262_v8 = vadd.f32 %v2467_v5, %v1261_v7 }
 0x56c   : > { %v2685_v9 = vpop.f32.mrf.mxu1 }
 0x56d   : > { %v1267_v10 = vadd.f32 %v1262_v8, %v3106_v6  ;;  %v2845_v6 = vld [vmem:[%s3052_s16 + $0x50] sm:$0xff]  }
 0x56e   : > { %v1264_v11 = vpop.f32.mrf.mxu1  ;;  %2698 = vmatpush3.bf16.msra.mxu1 %v2845_v6 }
 0x56f   : > { %v1271_v12 = vsel %vm562_vm2, %v1267_v10, 0.0  ;;  %2711 = vmatprep.subr.bf16.mxu1 %v2936_v2 }
 0x570   : > { %1272 = vadd.xlane.f32.xlu0 %v1271_v12  ;;  %v2686_v13 = vpop.f32.mrf.mxu1 }
 0x571   : > { %2700 = vmatmul.mubr.msk.bf16.vlgmr.msra.gmra.mxu1 %vm562_vm2, %v1380_v22 }
 0x572   : > { %2713 = vmatprep.mubr.msk.bf16.mxu1 %vm2937_vm1, %v2936_v2 }
 0x5f9   : > { %v1273_v14 = vpop.xlane.xlu0 %1272 }
 0x5fa   : > { %v1275_v15 = vmul.f32 0.03125, %v1273_v14 }
 0x5fc   : > { %v1276_v16 = vsub.f32 %v1267_v10, %v1275_v15 }
 0x5fe   : > { %v1277_v17 = vmul.f32 %v1276_v16, %v1276_v16 }
 0x600   : > { %v1278_v18 = vsel %vm562_vm2, %v1277_v17, 0.0 }
 0x601   : > { %1279 = vadd.xlane.f32.xlu1 %v1278_v18 }
 0x631   : > { %v1436_v36 = vpop.f32.mrf.mxu1 }
 0x632   : > { %v1437_v38 = vadd.f32 %v2488_v35, %v1436_v36 }
 0x633   : > { %v2701_v37 = vpop.f32.mrf.mxu1 }
 0x635   : > { %v1439_v39 = vpop.f32.mrf.mxu1 }
 0x636   : > { %v1440_v40 = vadd.f32 %v2488_v35, %v1439_v39 }
 0x637   : > { %v2702_v41 = vpop.f32.mrf.mxu1 }
 0x638   : > { %v1520_v42 = vpack.c.bf16 %v1440_v40, %v1437_v38 }
 0x63a   : > { %1573 = vrot.lane.b32.xlu0 %v1520_v42, %s2939_s3  ;;  %v1527_v43 = vsel %vm747_vm3, %v1520_v42, 0 }
 0x63b   : > { %2712 = vmatpush3.bf16.xpose.msra.mxu1 %v1527_v43 }
 0x63c   : > { %2723 = vmatprep.subr.bf16.mxu1 %v2936_v2 }
 0x63e   : > { %1623 = vrot.lane.b32.xlu0 %v1520_v42, %s2938_s2 }
 0x68a   : > { %v1280_v25 = vpop.xlane.xlu1 %1279 }
 0x68b   : > { %v1281_v26 = vmul.f32 0.03125, %v1280_v25 }
 0x68d   : > { %v1282_v27 = vadd.f32 1e-05, %v1281_v26 }
 0x68f   : > { %2874 = vrsqrt.f32 %v1282_v27 }
 0x69c   : > { %v2875_v28 = vpop.eup %2874 }
 0x69d   : > { %v1284_v30 = vmul.f32 %v2875_v28, %v1276_v16 }
 0x69f   : > { %v1291_v32 = vmul.f32 %v2472_v29, %v1284_v30 }
 0x6a1   : > { %v3223_v33 = vadd.f32 %v2473_v31, %v1291_v32 }
 0x6a3   : > { %v1310_v34 = vpack.c.bf16 %v3223_v33, %v3223_v33 }
 0x6a5   : > { %2692 = vmatmul.mubr.msk.bf16.vlgmr.msra.gmra.mxu0 %vm562_vm2, %v1310_v34 }
 0x6a6   : > { %2707 = vmatprep.mubr.msk.bf16.mxu0 %vm2937_vm1, %v2936_v2  ;;  %2704 = vmatpush3.bf16.msra.mxu0 %v2848_v44 }
 0x6a7   : > { %2705 = vmatprep.subr.bf16.mxu0 %v2936_v2 }
 0x6aa   : > { %2706 = vmatpush3.bf16.msra.mxu0 %v2849_v45 }
 0x6ab   : > { %2717 = vmatprep.subr.bf16.mxu0 %v2936_v2 }
 0x6ac   : > { %v1574_v49 = vpop.permute.xlu0 %1573 }
 0x6ad   : > { %2708 = vmatmul.mubr.msk.bf16.vlgmr.msra.gmra.mxu0 %vm562_vm2, %v1450_v48  ;;  %v1579_v50 = vsel %vm747_vm3, %v1574_v49, 0 }
 0x6ae   : > { %2719 = vmatprep.mubr.msk.bf16.mxu0 %vm2937_vm1, %v2936_v2  ;;  %2718 = vmatpush3.bf16.xpose.msra.mxu0 %v1579_v50 }
 0x6af   : > { %2729 = vmatprep.subr.bf16.mxu0 %v2936_v2 }
 0x6b0   : > { %v1624_v56 = vpop.permute.xlu0 %1623 }
 0x6b1   : > { %v1629_v60 = vsel %vm747_vm3, %v1624_v56, 0 }
 0x765   : > { %v1366_v52 = vpop.f32.mrf.mxu0 }
 0x766   : > { %v1367_v53 = vadd.f32 %v2479_v51, %v1366_v52 }
 0x767   : > { %v2693_v54 = vpop.f32.mrf.mxu0 }
 0x768   : > { %v1372_v55 = vmul.f32 0.35355338, %v1367_v53 }
 0x769   : > { %v1369_v57 = vpop.f32.mrf.mxu0 }
 0x76a   : > { %v1522_v58 = vpack.c.bf16 %v1372_v55, %v1372_v55 }
 0x76b   : > { %v2694_v59 = vpop.f32.mrf.mxu0 }
 0x76c   : > { %1621 = vrot.lane.b32.xlu0 %v1522_v58, %s2938_s2  ;;  %1570 = vrot.lane.b32.xlu1 %v1522_v58, %s2939_s3 }
 0x76d   : > { %2714 = vmatmul.mubr.msk.bf16.vlgmr.msra.gmra.mxu1 %vm747_vm3, %v1522_v58  ;;  %v1506_v61 = vpop.f32.mrf.mxu0 }
 0x76e   : > { %2724 = vmatpush3.bf16.xpose.msra.mxu1 %v1629_v60  ;;  %2725 = vmatprep.mubr.msk.bf16.mxu1 %vm2937_vm1, %v2936_v2  ;;  %v1507_v3 = vadd.f32 %v2497_v1, %v1506_v61 }
 0x76f   : > { %2735 = vmatprep.subr.bf16.mxu1 %v2936_v2  ;;  %v2709_v62 = vpop.f32.mrf.mxu0 }
 0x770   : > { %1673 = vrot.lane.b32.xlu1 %v1520_v42, %s2940_s4 }
 0x771   : > { %v1509_v63 = vpop.f32.mrf.mxu0 }
 0x772   : > { %v1510_v4 = vadd.f32 %v2497_v1, %v1509_v63 }
 0x773   : > { %v2710_v0 = vpop.f32.mrf.mxu0 }
 0x774   : > { %1671 = vrot.lane.b32.xlu1 %v1522_v58, %s2940_s4  ;;  %v3257_v5 = vpack.c.bf16 %v1510_v4, %v1507_v3 }
 0x7de   : > { %v1622_v7 = vpop.permute.xlu0 %1621  ;;  %v1571_v8 = vpop.permute.xlu1 %1570 }
 0x7df   : > { %2720 = vmatmul.mubr.msk.bf16.vlgmr.msra.gmra.mxu0 %vm747_vm3, %v1571_v8  ;;  %2726 = vmatmul.mubr.msk.bf16.vlgmr.msra.gmra.mxu1 %vm747_vm3, %v1622_v7 }
 0x7e0   : > { %2731 = vmatprep.mubr.msk.bf16.mxu0 %vm2937_vm1, %v2936_v2  ;;  %2736 = vmatpush3.bf16.msra.mxu1 %v3257_v5 }
 0x7e1   : > { %2737 = vmatprep.mubr.msk.bf16.mxu1 %vm2937_vm1, %v2936_v2  ;;  %2747 = vmatprep.subr.bf16.mxu1 %v2936_v2 }
 0x7e2   : > { %v1674_v9 = vpop.permute.xlu1 %1673 }
 0x7e3   : > { %v1679_v10 = vsel %vm747_vm3, %v1674_v9, 0  ;;  %v2850_v9 = vld [vmem:[%s3052_s16 + $0x78] sm:$0xff]  }
 0x7e4   : > { %2730 = vmatpush3.bf16.xpose.msra.mxu0 %v1679_v10 }
 0x7e5   : > { %2741 = vmatprep.subr.bf16.mxu0 %v2936_v2 }
 0x7e6   : > { %v1672_v11 = vpop.permute.xlu1 %1671 }
 0x7eb   : > { %2732 = vmatmul.mubr.msk.bf16.vlgmr.msra.gmra.mxu0 %vm747_vm3, %v1672_v11  ;;  %v2851_v11 = vld [vmem:[%s3052_s16 + $0x70] sm:$0xff]  }
 0x7ec   : > { %2743 = vmatprep.mubr.msk.bf16.mxu0 %vm2937_vm1, %v2936_v2 }
 0x82d   : > { %v1563_v12 = vpop.f32.mrf.mxu1 }
 0x82e   : > { %v1721_v13 = vsel %vm1201_vm5, %v1563_v12, -inf }
 0x82f   : > { %1722 = vmax.xlane.f32.xlu0 %v1721_v13  ;;  %v2715_v14 = vpop.f32.mrf.mxu1 }
 0x831   : > { %v1566_v15 = vpop.f32.mrf.mxu1 }
 0x833   : > { %v2716_v16 = vpop.f32.mrf.mxu1 }
 0x89f   : > { %v1615_v17 = vpop.f32.mrf.mxu0  ;;  %v1665_v18 = vpop.f32.mrf.mxu1 }
 0x8a0   : > { %v1727_v19 = vsel %vm1201_vm5, %v1665_v18, -inf  ;;  %v1724_v6 = vsel %vm1201_vm5, %v1615_v17, -inf }
 0x8a1   : > { %1728 = vmax.xlane.f32.xlu0 %v1727_v19  ;;  %v2727_v20 = vpop.f32.mrf.mxu1  ;;  %1725 = vmax.xlane.f32.xlu1 %v1724_v6  ;;  %v2721_v21 = vpop.f32.mrf.mxu0 }
 0x8a3   : > { %v1618_v22 = vpop.f32.mrf.mxu0  ;;  %v1668_v23 = vpop.f32.mrf.mxu1 }
 0x8a5   : > { %v2722_v24 = vpop.f32.mrf.mxu0  ;;  %v2728_v25 = vpop.f32.mrf.mxu1 }
 0x8ab   : > { %v1715_v26 = vpop.f32.mrf.mxu0 }
 0x8ac   : > { %v1730_v27 = vsel %vm1201_vm5, %v1715_v26, -inf }
 0x8ad   : > { %1731 = vmax.xlane.f32.xlu0 %v1730_v27  ;;  %v2733_v28 = vpop.f32.mrf.mxu0 }
 0x8af   : > { %v1718_v29 = vpop.f32.mrf.mxu0 }
 0x8b1   : > { %v2734_v30 = vpop.f32.mrf.mxu0 }
 0x8b8   : > { %v1723_v31 = vpop.xlane.xlu0 %1722 }
 0x8b9   : > { %v1733_v32 = vsub.f32 %v1563_v12, %v1723_v31 }
 0x8bb   : > { %v1737_v34 = vmul.f32 1.442695, %v1733_v32 }
 0x8bd   : > { %2876 = vpow2.f32 %v1737_v34  ;;  %v2514_v34 = vld [vmem:[%s3058_s24 + $0x7] ss:$0 sm:$0xff] }
 0x8ca   : > { %v2877_v35 = vpop.eup %2876 }
 0x8cb   : > { %v1745_v36 = vsel %vm1201_vm5, %v2877_v35, 0.0 }
 0x8cc   : > { %1746 = vadd.xlane.f32.xlu1 %v1745_v36 }
 0x8dd   : > { %1813 = vrot.lane.b32.xlu1 %v3257_v5, %s2939_s3 }
 0x92a   : > { %v1729_v37 = vpop.xlane.xlu0 %1728  ;;  %v1726_v38 = vpop.xlane.xlu1 %1725 }
 0x92b   : > { %v1735_v39 = vsub.f32 %v1665_v18, %v1729_v37  ;;  %v1734_v40 = vsub.f32 %v1615_v17, %v1726_v38 }
 0x92d   : > { %v1741_v41 = vmul.f32 1.442695, %v1735_v39  ;;  %v1739_v42 = vmul.f32 1.442695, %v1734_v40 }
 0x92f   : > { %2878 = vpow2.f32 %v1741_v41 }
 0x930   : > { %2880 = vpow2.f32 %v1739_v42 }
 0x936   : > { %v1732_v43 = vpop.xlane.xlu0 %1731 }
 0x937   : > { %v1736_v44 = vsub.f32 %v1715_v26, %v1732_v43 }
 0x939   : > { %v1743_v45 = vmul.f32 1.442695, %v1736_v44 }
 0x93b   : > { %2882 = vpow2.f32 %v1743_v45 }
 0x93c   : > { %v2879_v46 = vpop.eup %2878 }
 0x93d   : > { %v2881_v47 = vpop.eup %2880  ;;  %v1751_v48 = vsel %vm1201_vm5, %v2879_v46, 0.0 }
 0x93e   : > { %1752 = vadd.xlane.f32.xlu1 %v1751_v48  ;;  %v1748_v49 = vsel %vm1201_vm5, %v2881_v47, 0.0  ;;  %v2853_v48 = vld [vmem:[%s3064_s1] sm:$0xff]  }
 0x93f   : > { %1749 = vadd.xlane.f32.xlu0 %v1748_v49  ;;  %v2855_v49 = vld [vmem:[%s3078_s15 + $0x10] sm:$0xff]  }
 0x948   : > { %v2883_v50 = vpop.eup %2882 }
 0x949   : > { %v1754_v51 = vsel %vm1201_vm5, %v2883_v50, 0.0 }
 0x94a   : > { %1755 = vadd.xlane.f32.xlu0 %v1754_v51 }
 0x94f   : > { %1907 = vrot.lane.b32.xlu1 %v3257_v5, %s2940_s4 }
 0x955   : > { %v1747_v52 = vpop.xlane.xlu1 %1746 }
 0x956   : > { %2884 = vrcp.f32 %v1747_v52 }
 0x959   : > { %v1814_v53 = vpop.permute.xlu1 %1813 }
 0x95a   : > { %2742 = vmatpush3.bf16.msra.mxu0 %v1814_v53 }
 0x95b   : > { %2753 = vmatprep.subr.bf16.mxu0 %v2936_v2 }
 0x960   : > { %1859 = vrot.lane.b32.xlu0 %v3257_v5, %s2938_s2 }
 0x963   : > { %v2885_v57 = vpop.eup %2884 }
 0x964   : > { %v1761_v59 = vmul.f32 %v2885_v57, %v2877_v35 }
 0x9c7   : > { %v1753_v55 = vpop.xlane.xlu1 %1752 }
 0x9c8   : > { %v1750_v54 = vpop.xlane.xlu0 %1749 }
 0x9c9   : > { %2886 = vrcp.f32 %v1750_v54  ;;  %v2520_v54 = vld [vmem:[%s3089_s22 + $0x2] ss:$0 sm:$0xff] }
 0x9ca   : > { %2888 = vrcp.f32 %v1753_v55 }
 0x9cb   : > { %v1908_v0 = vpop.permute.xlu1 %1907 }
 0x9d3   : > { %v1756_v56 = vpop.xlane.xlu0 %1755 }
 0x9d4   : > { %2890 = vrcp.f32 %v1756_v56  ;;  %v2521_v56 = vld [vmem:[%s3089_s22 + $0x3] ss:$0 sm:$0xff] }
 0x9d6   : > { %v2887_v58 = vpop.eup %2886 }
 0x9d7   : > { %v1762_v60 = vmul.f32 %v2887_v58, %v2881_v47  ;;  %v1860_v62 = vpop.permute.xlu0 %1859  ;;  %v2889_v1 = vpop.eup %2888  ;;  %v2852_v47 = vld [vmem:[%s3064_s1 + $0x8] sm:$0xff]  }
 0x9d8   : > { %v1763_v4 = vmul.f32 %v2889_v1, %v2879_v46 }
 0x9d9   : > { %v1765_v61 = vpack.c.bf16 %v1762_v60, %v1761_v59  ;;  %v2856_v60 = vld [vmem:[%s3078_s15 + $0x8] sm:$0xff]  }
 0x9db   : > { %2738 = vmatmul.mubr.msk.bf16.vlgmr.msra.gmra.mxu1 %vm1201_vm5, %v1765_v61  ;;  %v1811_v63 = vrot.slane %v1765_v61, 4  ;;  %v2857_v61 = vld [vmem:[%s3078_s15] sm:$0xff]  }
 0x9dc   : > { %2748 = vmatpush3.bf16.msra.mxu1 %v1860_v62  ;;  %2749 = vmatprep.mubr.msk.bf16.mxu1 %vm2937_vm1, %v2936_v2  ;;  %v2522_v62 = vld [vmem:[%s512_s30] ss:$0 sm:$0xff] }
 0x9dd   : > { %2744 = vmatmul.mubr.msk.bf16.vlgmr.msra.gmra.mxu0 %vm1201_vm5, %v1811_v63  ;;  %2759 = vmatprep.subr.bf16.mxu1 %v2936_v2 }
 0x9de   : > { %2754 = vmatpush3.bf16.msra.mxu0 %v1908_v0  ;;  %2755 = vmatprep.mubr.msk.bf16.mxu0 %vm2937_vm1, %v2936_v2 }
 0x9df   : > { %2767 = vmatprep.subr.bf16.mxu0 %v2936_v2 }
 0x9e1   : > { %v2891_v3 = vpop.eup %2890 }
 0x9e2   : > { %v1764_v5 = vmul.f32 %v2891_v3, %v2883_v50 }
 0x9e4   : > { %v1766_v7 = vpack.c.bf16 %v1764_v5, %v1763_v4 }
 0x9e6   : > { %2750 = vmatmul.mubr.msk.bf16.vlgmr.msra.gmra.mxu1 %vm1201_vm5, %v1766_v7  ;;  %v1906_v8 = vrot.slane %v1766_v7, 4 }
 0x9e7   : > { %2763 = vmatprep.mubr.msk.bf16.mxu1 %vm2937_vm1, %v2936_v2  ;;  %2760 = vmatpush3.bf16.msra.mxu1 %v2850_v9 }
 0x9e8   : > { %2756 = vmatmul.mubr.msk.bf16.vlgmr.msra.gmra.mxu0 %vm1201_vm5, %v1906_v8  ;;  %2761 = vmatprep.subr.bf16.mxu1 %v2936_v2 }
 0x9e9   : > { %2771 = vmatprep.mubr.msk.bf16.mxu0 %vm2937_vm1, %v2936_v2  ;;  %2768 = vmatpush3.bf16.msra.mxu0 %v2852_v47 }
 0x9ea   : > { %2769 = vmatprep.subr.bf16.mxu0 %v2936_v2 }
 0x9eb   : > { %2762 = vmatpush3.bf16.msra.mxu1 %v2851_v11 }
 0x9ec   : > { %2775 = vmatprep.subr.bf16.mxu1 %v2936_v2 }
 0x9ed   : > { %2770 = vmatpush3.bf16.msra.mxu0 %v2853_v48 }
 0xa9b   : > { %v1804_v10 = vpop.f32.mrf.mxu1 }
 0xa9d   : > { %v2739_v12 = vpop.f32.mrf.mxu1  ;;  %v1853_v13 = vpop.f32.mrf.mxu0 }
 0xa9e   : > { %1954 = vrot.lane.b32.xlu1 %v1853_v13, %s2941_s13 }
 0xa9f   : > { %v1807_v14 = vpop.f32.mrf.mxu1  ;;  %v2745_v15 = vpop.f32.mrf.mxu0 }
 0xaa1   : > { %v2740_v16 = vpop.f32.mrf.mxu1  ;;  %v1856_v17 = vpop.f32.mrf.mxu0 }
 0xaa3   : > { %v2746_v18 = vpop.f32.mrf.mxu0 }
 0xaa6   : > { %v1899_v19 = vpop.f32.mrf.mxu1 }
 0xaa7   : > { %1958 = vrot.lane.b32.xlu0 %v1899_v19, %s2942_s17 }
 0xaa8   : > { %v2751_v6 = vpop.f32.mrf.mxu1  ;;  %v1947_v20 = vpop.f32.mrf.mxu0 }
 0xaa9   : > { %1962 = vrot.lane.b32.xlu1 %v1947_v20, %s2943_s21 }
 0xaaa   : > { %v1902_v21 = vpop.f32.mrf.mxu1  ;;  %v2757_v22 = vpop.f32.mrf.mxu0 }
 0xaac   : > { %v2752_v23 = vpop.f32.mrf.mxu1  ;;  %v1950_v24 = vpop.f32.mrf.mxu0 }
 0xaad   : > { %v2534_v23 = vld [vmem:[%s3089_s22 + $0x4] ss:$0 sm:$0xff] }
 0xaae   : > { %v2758_v25 = vpop.f32.mrf.mxu0 }
 0xaaf   : > { %v2535_v25 = vld [vmem:[%s3089_s22 + $0x5] ss:$0 sm:$0xff] }
 0xb10   : > { %v1955_v26 = vpop.permute.xlu1 %1954 }
 0xb11   : > { %v1965_v27 = vsel %vm747_vm3, %v1804_v10, %v1955_v26 }
 0xb19   : > { %v1959_v28 = vpop.permute.xlu0 %1958 }
 0xb1a   : > { %v1966_v29 = vsel %vm1201_vm5, %v1965_v27, %v1959_v28 }
 0xb1b   : > { %v1963_v30 = vpop.permute.xlu1 %1962 }
 0xb1c   : > { %v1967_v31 = vsel %vm1203_vm6, %v1966_v29, %v1963_v30 }
 0xb1d   : > { %v1968_v32 = vpack.c.bf16 %v1967_v31, %v1967_v31 }
 0xb1f   : > { %2764 = vmatmul.mubr.msk.bf16.vlgmr.msra.gmra.mxu1 %vm562_vm2, %v1968_v32 }
 0xb20   : > { %2783 = vmatprep.mubr.msk.bf16.mxu1 %vm2937_vm1, %v2936_v2 }
 0xbdf   : > { %v2024_v35 = vpop.f32.mrf.mxu1 }
 0xbe0   : > { %v2025_v36 = vadd.f32 %v2514_v34, %v2024_v35 }
 0xbe1   : > { %v2765_v37 = vpop.f32.mrf.mxu1 }
 0xbe2   : > { %v2030_v38 = vadd.f32 %v2025_v36, %v3223_v33  ;;  %v2854_v33 = vld [vmem:[%s3078_s15 + $0x18] sm:$0xff]  }
 0xbe3   : > { %v2027_v39 = vpop.f32.mrf.mxu1  ;;  %2776 = vmatpush3.bf16.msra.mxu1 %v2854_v33 }
 0xbe4   : > { %v2035_v40 = vsel %vm562_vm2, %v2030_v38, 0.0  ;;  %2777 = vmatprep.subr.bf16.mxu1 %v2936_v2 }
 0xbe5   : > { %2036 = vadd.xlane.f32.xlu0 %v2035_v40  ;;  %v2766_v41 = vpop.f32.mrf.mxu1 }
 0xbe7   : > { %2778 = vmatpush3.bf16.msra.mxu1 %v2855_v49 }
 0xbe8   : > { %2779 = vmatprep.subr.bf16.mxu1 %v2936_v2 }
 0xbeb   : > { %2780 = vmatpush3.bf16.msra.mxu1 %v2856_v60 }
 0xbec   : > { %2781 = vmatprep.subr.bf16.mxu1 %v2936_v2  ;;  %v2526_v2 = vld [vmem:[%s520_s12] ss:$0 sm:$0xff] }
 0xbef   : > { %2782 = vmatpush3.bf16.msra.mxu1 %v2857_v61 }
 0xc6e   : > { %v2037_v42 = vpop.xlane.xlu0 %2036 }
 0xc6f   : > { %v2038_v43 = vmul.f32 0.03125, %v2037_v42 }
 0xc71   : > { %v2039_v44 = vsub.f32 %v2030_v38, %v2038_v43 }
 0xc73   : > { %v2040_v45 = vmul.f32 %v2039_v44, %v2039_v44 }
 0xc75   : > { %v2041_v46 = vsel %vm562_vm2, %v2040_v45, 0.0 }
 0xc76   : > { %2042 = vadd.xlane.f32.xlu1 %v2041_v46 }
 0xcff   : > { %v2043_v50 = vpop.xlane.xlu1 %2042 }
 0xd00   : > { %v2044_v51 = vmul.f32 0.03125, %v2043_v50 }
 0xd02   : > { %v2045_v52 = vadd.f32 1e-05, %v2044_v51 }
 0xd04   : > { %2892 = vrsqrt.f32 %v2045_v52 }
 0xd11   : > { %v2893_v53 = vpop.eup %2892 }
 0xd12   : > { %v2047_v55 = vmul.f32 %v2893_v53, %v2039_v44 }
 0xd14   : > { %v2054_v57 = vmul.f32 %v2520_v54, %v2047_v55 }
 0xd16   : > { %v2061_v58 = vadd.f32 %v2521_v56, %v2054_v57 }
 0xd18   : > { %v2067_v59 = vpack.c.bf16 %v2061_v58, %v2061_v58 }
 0xd1a   : > { %2772 = vmatmul.mubr.msk.bf16.vlgmr.msra.gmra.mxu0 %vm562_vm2, %v2067_v59 }
 0xdda   : > { %v2123_v63 = vpop.f32.mrf.mxu0 }
 0xddb   : > { %v2124_v0 = vadd.f32 %v2522_v62, %v2123_v63 }
 0xddc   : > { %v2773_v1 = vpop.f32.mrf.mxu0 }
 0xddd   : > { %v2129_v3 = vmax.f32 %v2124_v0, 0.0 }
 0xdde   : > { %v2126_v4 = vpop.f32.mrf.mxu0 }
 0xddf   : > { %v2139_v5 = vpack.c.bf16 %v2129_v3, %v2129_v3 }
 0xde0   : > { %v2774_v7 = vpop.f32.mrf.mxu0 }
 0xde1   : > { %2784 = vmatmul.mubr.msk.bf16.vlgmr.msra.gmra.mxu1 %vm2170_vm7, %v2139_v5 }
 0xea1   : > { %v2208_v8 = vpop.f32.mrf.mxu1 }
 0xea2   : > { %v2209_v9 = vadd.f32 %v2526_v2, %v2208_v8 }
 0xea3   : > { %v2785_v10 = vpop.f32.mrf.mxu1 }
 0xea4   : > { %v2214_v11 = vadd.f32 %v2209_v9, %v2061_v58 }
 0xea5   : > { %v2211_v12 = vpop.f32.mrf.mxu1 }
 0xea6   : > { %v2219_v13 = vsel %vm562_vm2, %v2214_v11, 0.0 }
 0xea7   : > { %2220 = vadd.xlane.f32.xlu0 %v2219_v13  ;;  %v2786_v14 = vpop.f32.mrf.mxu1 }
 0xf30   : > { %v2221_v15 = vpop.xlane.xlu0 %2220 }
 0xf31   : > { %v2222_v16 = vmul.f32 0.03125, %v2221_v15 }
 0xf33   : > { %v2223_v17 = vsub.f32 %v2214_v11, %v2222_v16 }
 0xf35   : > { %v2224_v18 = vmul.f32 %v2223_v17, %v2223_v17 }
 0xf37   : > { %v2225_v19 = vsel %vm562_vm2, %v2224_v18, 0.0 }
 0xf38   : > { %2226 = vadd.xlane.f32.xlu0 %v2225_v19 }
 0xfc1   : > { %v2227_v6 = vpop.xlane.xlu0 %2226 }
 0xfc2   : > { %v2228_v20 = vmul.f32 0.03125, %v2227_v6 }
 0xfc4   : > { %v2229_v21 = vadd.f32 1e-05, %v2228_v20 }
 0xfc6   : > { %2894 = vrsqrt.f32 %v2229_v21 }
 0xfd3   : > { %v2895_v22 = vpop.eup %2894 }
 0xfd4   : > { %v2231_v24 = vmul.f32 %v2895_v22, %v2223_v17 }
 0xfd6   : > { %v2238_v26 = vmul.f32 %v2534_v23, %v2231_v24 }
 0xfd8   : > { %v2245_v27 = vadd.f32 %v2535_v25, %v2238_v26 }
 0xfda   : > { %2246 = vst.msk [vmem:[%s3084_s0] sm:$0xff] %vm562_vm2, %v2245_v27 }
 0xfdb PF: > { %s3391_s20 = sld [smem:[#allocation4_spill]] }
 0xfdc   : > { %s3392_s13 = sld [smem:[#allocation2_spill]] }
 0xfdd   : > { %s3393_s14 = sld [smem:[#allocation3_spill]] }
 0xfde   : > { %s3394_s15 = sld [smem:[#allocation5_spill]] }
 0xfdf   : > { %s3395_s16 = sld [smem:[#allocation6_spill]] }
 0xfe1   : > { %s20_s17 = sadd.s32 1, %s3391_s20  }
 0xfe2   : > { %p17_p8 = scmp.ge.s32.totalorder %s20_s17, 6  }
 0xfe4   :  { %19 = sbr.rel (!%p17_p8) target bundleno = 6 (0x6), region = 140 }

</bundles_post_ra>
